<compile_context>
chip_gen: v7x
topology: tpu7x:2x2x1
jax: 0.10.0
libtpu: 0.0.40
codegen_flags: <defaults>
</compile_context>

<pallas_src>
import jax
import jax.numpy as jnp
from jax.experimental import pallas as pl
from jax.experimental.pallas import tpu as pltpu


def _lstm_seq_kernel(x_ref, wih_ref, whh_ref, b_ref, wfc_ref, bfc_ref,
                     h0_ref, c0_ref, out_ref, xproj_sc):
    # x_ref    : [T*BP, D]   time-major input, batch padded to BP, flattened
    # wih_ref  : [D, 4*HP]   per-gate 128-lane-padded W_ih^T
    # whh_ref  : [HP, 4*HP]  per-gate 128-lane-padded W_hh^T
    # b_ref    : [1, 4*HP]   b_ih + b_hh (gate-padded with zeros)
    # wfc_ref  : [HP, O], bfc_ref: [1, O]
    # h0/c0    : [BP, HP] ; out_ref: [BP, O] ; xproj_sc: VMEM [T*BP, 4*HP]
    G = wih_ref.shape[1]
    HP = G // 4
    BP = h0_ref.shape[0]
    T = x_ref.shape[0] // BP

    # (1) One batched matmul for the input projection of all timesteps (bias folded in).
    xproj_sc[...] = (jnp.dot(x_ref[...], wih_ref[...],
                             preferred_element_type=jnp.float32) + b_ref[...])

    # (2) Loop-invariant recurrent weight, loaded once.
    whh = whh_ref[...]

    # (3) Fully-unrolled time recurrence; h/c carried as values (stay in vregs).
    def step(t, carry):
        h, c = carry
        row = pl.multiple_of(t * BP, BP)
        gates = xproj_sc[pl.ds(row, BP), :] + jnp.dot(
            h, whh, preferred_element_type=jnp.float32)            # [BP, 4*HP]
        # 128-lane-aligned gate slices (PyTorch LSTMCell gate order i, f, g, o).
        i_g = jax.nn.sigmoid(gates[:, 0 * HP:1 * HP])
        f_g = jax.nn.sigmoid(gates[:, 1 * HP:2 * HP])
        g_g = jnp.tanh(gates[:, 2 * HP:3 * HP])
        o_g = jax.nn.sigmoid(gates[:, 3 * HP:4 * HP])
        c = f_g * c + i_g * g_g
        h = o_g * jnp.tanh(c)
        return h, c

    h, _ = jax.lax.fori_loop(0, T, step, (h0_ref[...], c0_ref[...]), unroll=True)

    # (4) fc_enc applied to the final hidden state only (the PyTorch loop overwrites
    #     `output` every step, so only the last timestep's fc matters).
    out_ref[...] = (jnp.dot(h, wfc_ref[...], preferred_element_type=jnp.float32)
                    + bfc_ref[...]).astype(out_ref.dtype)


def sequence_forward(x, w_ih, w_hh, b_ih, b_hh, w_fc, b_fc, h0, c0):
    """x: [T, B, D] f32.  Returns fc_enc(h_T): [B, output_dim]."""
    T, B, D = x.shape
    H = h0.shape[1]
    O = w_fc.shape[0]
    HP = ((H + 127) // 128) * 128     # pad each gate block to a 128-lane multiple
    BP = ((B + 7) // 8) * 8           # pad batch to a full 8-sublane group

    # Per-gate padded / transposed weights: each gate occupies its own 128-lane-aligned
    # HP-wide block, and the padded lanes/rows are exactly zero (so sigmoid(0)=0.5,
    # tanh(0)=0 keeps padded h/c lanes at 0 and they never leak into the output).
    wih_t = jnp.pad(w_ih.reshape(4, H, D), ((0, 0), (0, HP - H), (0, 0)))
    wih_t = wih_t.transpose(2, 0, 1).reshape(D, 4 * HP)                     # [D, 4*HP]
    whh_t = jnp.pad(w_hh.reshape(4, H, H), ((0, 0), (0, HP - H), (0, HP - H)))
    whh_t = whh_t.transpose(2, 0, 1).reshape(HP, 4 * HP)                    # [HP, 4*HP]
    b = jnp.pad((b_ih + b_hh).reshape(4, H), ((0, 0), (0, HP - H))).reshape(1, 4 * HP)
    wfc_t = jnp.pad(w_fc.T, ((0, HP - H), (0, 0)))                          # [HP, O]
    bfc = b_fc.reshape(1, O)                                                # [1, O]

    x_flat = jnp.pad(x, ((0, 0), (0, BP - B), (0, 0))).reshape(T * BP, D)   # [T*BP, D]
    h0p = jnp.pad(h0, ((0, BP - B), (0, HP - H)))                           # [BP, HP]
    c0p = jnp.pad(c0, ((0, BP - B), (0, HP - H)))

    vmem = lambda: pl.BlockSpec(memory_space=pltpu.MemorySpace.VMEM)
    out = pl.pallas_call(
        _lstm_seq_kernel,
        out_shape=jax.ShapeDtypeStruct((BP, O), jnp.float32),
        in_specs=[vmem() for _ in range(8)],
        out_specs=vmem(),
        scratch_shapes=[pltpu.VMEM((T * BP, 4 * HP), jnp.float32)],  # precomputed x-projection
    )(x_flat, wih_t, whh_t, b, wfc_t, bfc, h0p, c0p)
    return out[:B]


def reference_forward(x, w_ih, w_hh, b_ih, b_hh, w_fc, b_fc, h0, c0):
    """Pure-JAX reference matching PyTorch LSTMCell + Linear (eval mode)."""
    H = h0.shape[1]
    h, c = h0, c0
    for t in range(x.shape[0]):
        gates = x[t] @ w_ih.T + b_ih + h @ w_hh.T + b_hh
        i = jax.nn.sigmoid(gates[:, 0:H])
        f = jax.nn.sigmoid(gates[:, H:2 * H])
        g = jnp.tanh(gates[:, 2 * H:3 * H])
        o = jax.nn.sigmoid(gates[:, 3 * H:4 * H])
        c = f * c + i * g
        h = o * jnp.tanh(c)
    return h @ w_fc.T + b_fc


if __name__ == "__main__":
    # Module hyperparameters (from the file's globals); numlayers = 1 so the
    # inter-layer dropout path is unused.
    input_dim = 8
    hidden_size = 64
    output_dim = 3

    seq_len = 8
    batch = 4

    key = jax.random.PRNGKey(0)
    ks = jax.random.split(key, 8)
    bound = 1.0 / jnp.sqrt(hidden_size)

    # Deterministic parameter init (uniform in [-1/sqrt(H), 1/sqrt(H)], like PyTorch defaults).
    w_ih = jax.random.uniform(ks[0], (4 * hidden_size, input_dim), jnp.float32, -bound, bound)
    w_hh = jax.random.uniform(ks[1], (4 * hidden_size, hidden_size), jnp.float32, -bound, bound)
    b_ih = jax.random.uniform(ks[2], (4 * hidden_size,), jnp.float32, -bound, bound)
    b_hh = jax.random.uniform(ks[3], (4 * hidden_size,), jnp.float32, -bound, bound)
    w_fc = jax.random.uniform(ks[4], (output_dim, hidden_size), jnp.float32, -bound, bound)
    b_fc = jax.random.uniform(ks[5], (output_dim,), jnp.float32, -bound, bound)

    x = jax.random.normal(ks[6], (seq_len, batch, input_dim), jnp.float32)
    h0 = jnp.zeros((batch, hidden_size), jnp.float32)
    c0 = jnp.zeros((batch, hidden_size), jnp.float32)

    out = sequence_forward(x, w_ih, w_hh, b_ih, b_hh, w_fc, b_fc, h0, c0)
    out = jax.block_until_ready(out)

    ref = reference_forward(x, w_ih, w_hh, b_ih, b_hh, w_fc, b_fc, h0, c0)
    assert out.shape == (batch, output_dim)
    assert jnp.allclose(out, ref, atol=1e-5, rtol=1e-5), (out, ref)

    print("KERNEL_OK")
</pallas_src>

<mosaic_0001>
module attributes {stable_mosaic.version = 11 : i64} {
  func.func @_lstm_seq_kernel(%arg0: memref<64x8xf32, #tpu.memory_space<vmem>>, %arg1: memref<8x512xf32, #tpu.memory_space<vmem>>, %arg2: memref<128x512xf32, #tpu.memory_space<vmem>>, %arg3: memref<1x512xf32, #tpu.memory_space<vmem>>, %arg4: memref<128x3xf32, #tpu.memory_space<vmem>>, %arg5: memref<1x3xf32, #tpu.memory_space<vmem>>, %arg6: memref<8x128xf32, #tpu.memory_space<vmem>>, %arg7: memref<8x128xf32, #tpu.memory_space<vmem>>, %arg8: memref<8x3xf32, #tpu.memory_space<vmem>>, %arg9: memref<64x512xf32, #tpu.memory_space<vmem>>) attributes {dimension_semantics = [], scalar_prefetch = 0 : i64, scratch_operands = 1 : i64, tpu.core_type = #tpu.core_type<tc>} {
    %c0 = arith.constant 0 : index
    %c0_0 = arith.constant 0 : index
    %0 = vector.load %arg0[%c0, %c0_0] : memref<64x8xf32, #tpu.memory_space<vmem>>, vector<64x8xf32>
    %c0_1 = arith.constant 0 : index
    %c0_2 = arith.constant 0 : index
    %1 = vector.load %arg1[%c0_1, %c0_2] : memref<8x512xf32, #tpu.memory_space<vmem>>, vector<8x512xf32>
    %cst = arith.constant dense<0.000000e+00> : vector<64x512xf32>
    %2 = tpu.matmul %0, %1, %cst {dimension_numbers = #tpu.dot_dimension_numbers<[1], [0], [0], [1], [0, 0, 1, 1], [], []>} : vector<64x8xf32>, vector<8x512xf32>, vector<64x512xf32> -> vector<64x512xf32>
    %c0_3 = arith.constant 0 : index
    %c0_4 = arith.constant 0 : index
    %3 = vector.load %arg3[%c0_3, %c0_4] : memref<1x512xf32, #tpu.memory_space<vmem>>, vector<1x512xf32>
    %4 = vector.broadcast %3 : vector<1x512xf32> to vector<64x512xf32>
    %5 = arith.addf %2, %4 : vector<64x512xf32>
    %c0_5 = arith.constant 0 : index
    %c0_6 = arith.constant 0 : index
    %6 = vector.load %arg9[%c0_5, %c0_6] : memref<64x512xf32, #tpu.memory_space<vmem>>, vector<64x512xf32>
    tpu.vector_store %arg9[%c0_5, %c0_6], %5 {strides = array<i32>} : memref<64x512xf32, #tpu.memory_space<vmem>>, vector<64x512xf32>,
    %c0_7 = arith.constant 0 : index
    %c0_8 = arith.constant 0 : index
    %7 = vector.load %arg2[%c0_7, %c0_8] : memref<128x512xf32, #tpu.memory_space<vmem>>, vector<128x512xf32>
    %c0_9 = arith.constant 0 : index
    %c0_10 = arith.constant 0 : index
    %8 = vector.load %arg6[%c0_9, %c0_10] : memref<8x128xf32, #tpu.memory_space<vmem>>, vector<8x128xf32>
    %c0_11 = arith.constant 0 : index
    %c0_12 = arith.constant 0 : index
    %9 = vector.load %arg7[%c0_11, %c0_12] : memref<8x128xf32, #tpu.memory_space<vmem>>, vector<8x128xf32>
    %c0_i32 = arith.constant 0 : i32
    %c8_i32 = arith.constant 8 : i32
    %10 = arith.muli %c0_i32, %c8_i32 : i32
    %11 = tpu.assume_multiple %10, 8 : i32
    %12 = arith.index_cast %11 : i32 to index
    %c0_13 = arith.constant 0 : index
    %13 = vector.load %arg9[%12, %c0_13] : memref<64x512xf32, #tpu.memory_space<vmem>>, vector<8x512xf32>
    %cst_14 = arith.constant dense<0.000000e+00> : vector<8x512xf32>
    %14 = tpu.matmul %8, %7, %cst_14 {dimension_numbers = #tpu.dot_dimension_numbers<[1], [0], [0], [1], [0, 0, 1, 1], [], []>} : vector<8x128xf32>, vector<128x512xf32>, vector<8x512xf32> -> vector<8x512xf32>
    %15 = arith.addf %13, %14 : vector<8x512xf32>
    %16 = vector.extract_strided_slice %15 {offsets = [0, 0], sizes = [8, 128], strides = [1, 1]} : vector<8x512xf32> to vector<8x128xf32>
    %17 = arith.negf %16 : vector<8x128xf32>
    %18 = math.exp %17 : vector<8x128xf32>
    %cst_15 = arith.constant 1.000000e+00 : f32
    %19 = vector.broadcast %cst_15 : f32 to vector<8x128xf32>
    %20 = arith.addf %19, %18 : vector<8x128xf32>
    %21 = arith.divf %19, %20 : vector<8x128xf32>
    %22 = vector.extract_strided_slice %15 {offsets = [0, 128], sizes = [8, 128], strides = [1, 1]} : vector<8x512xf32> to vector<8x128xf32>
    %23 = arith.negf %22 : vector<8x128xf32>
    %24 = math.exp %23 : vector<8x128xf32>
    %cst_16 = arith.constant 1.000000e+00 : f32
    %25 = vector.broadcast %cst_16 : f32 to vector<8x128xf32>
    %26 = arith.addf %25, %24 : vector<8x128xf32>
    %27 = arith.divf %25, %26 : vector<8x128xf32>
    %28 = vector.extract_strided_slice %15 {offsets = [0, 256], sizes = [8, 128], strides = [1, 1]} : vector<8x512xf32> to vector<8x128xf32>
    %29 = math.tanh %28 : vector<8x128xf32>
    %30 = vector.extract_strided_slice %15 {offsets = [0, 384], sizes = [8, 128], strides = [1, 1]} : vector<8x512xf32> to vector<8x128xf32>
    %31 = arith.negf %30 : vector<8x128xf32>
    %32 = math.exp %31 : vector<8x128xf32>
    %cst_17 = arith.constant 1.000000e+00 : f32
    %33 = vector.broadcast %cst_17 : f32 to vector<8x128xf32>
    %34 = arith.addf %33, %32 : vector<8x128xf32>
    %35 = arith.divf %33, %34 : vector<8x128xf32>
    %36 = arith.mulf %27, %9 : vector<8x128xf32>
    %37 = arith.mulf %21, %29 : vector<8x128xf32>
    %38 = arith.addf %36, %37 : vector<8x128xf32>
    %39 = math.tanh %38 : vector<8x128xf32>
    %40 = arith.mulf %35, %39 : vector<8x128xf32>
    %c1_i32 = arith.constant 1 : i32
    %c8_i32_18 = arith.constant 8 : i32
    %41 = arith.muli %c1_i32, %c8_i32_18 : i32
    %42 = tpu.assume_multiple %41, 8 : i32
    %43 = arith.index_cast %42 : i32 to index
    %c0_19 = arith.constant 0 : index
    %44 = vector.load %arg9[%43, %c0_19] : memref<64x512xf32, #tpu.memory_space<vmem>>, vector<8x512xf32>
    %cst_20 = arith.constant dense<0.000000e+00> : vector<8x512xf32>
    %45 = tpu.matmul %40, %7, %cst_20 {dimension_numbers = #tpu.dot_dimension_numbers<[1], [0], [0], [1], [0, 0, 1, 1], [], []>} : vector<8x128xf32>, vector<128x512xf32>, vector<8x512xf32> -> vector<8x512xf32>
    %46 = arith.addf %44, %45 : vector<8x512xf32>
    %47 = vector.extract_strided_slice %46 {offsets = [0, 0], sizes = [8, 128], strides = [1, 1]} : vector<8x512xf32> to vector<8x128xf32>
    %48 = arith.negf %47 : vector<8x128xf32>
    %49 = math.exp %48 : vector<8x128xf32>
    %cst_21 = arith.constant 1.000000e+00 : f32
    %50 = vector.broadcast %cst_21 : f32 to vector<8x128xf32>
    %51 = arith.addf %50, %49 : vector<8x128xf32>
    %52 = arith.divf %50, %51 : vector<8x128xf32>
    %53 = vector.extract_strided_slice %46 {offsets = [0, 128], sizes = [8, 128], strides = [1, 1]} : vector<8x512xf32> to vector<8x128xf32>
    %54 = arith.negf %53 : vector<8x128xf32>
    %55 = math.exp %54 : vector<8x128xf32>
    %cst_22 = arith.constant 1.000000e+00 : f32
    %56 = vector.broadcast %cst_22 : f32 to vector<8x128xf32>
    %57 = arith.addf %56, %55 : vector<8x128xf32>
    %58 = arith.divf %56, %57 : vector<8x128xf32>
    %59 = vector.extract_strided_slice %46 {offsets = [0, 256], sizes = [8, 128], strides = [1, 1]} : vector<8x512xf32> to vector<8x128xf32>
    %60 = math.tanh %59 : vector<8x128xf32>
    %61 = vector.extract_strided_slice %46 {offsets = [0, 384], sizes = [8, 128], strides = [1, 1]} : vector<8x512xf32> to vector<8x128xf32>
    %62 = arith.negf %61 : vector<8x128xf32>
    %63 = math.exp %62 : vector<8x128xf32>
    %cst_23 = arith.constant 1.000000e+00 : f32
    %64 = vector.broadcast %cst_23 : f32 to vector<8x128xf32>
    %65 = arith.addf %64, %63 : vector<8x128xf32>
    %66 = arith.divf %64, %65 : vector<8x128xf32>
    %67 = arith.mulf %58, %38 : vector<8x128xf32>
    %68 = arith.mulf %52, %60 : vector<8x128xf32>
    %69 = arith.addf %67, %68 : vector<8x128xf32>
    %70 = math.tanh %69 : vector<8x128xf32>
    %71 = arith.mulf %66, %70 : vector<8x128xf32>
    %c2_i32 = arith.constant 2 : i32
    %c8_i32_24 = arith.constant 8 : i32
    %72 = arith.muli %c2_i32, %c8_i32_24 : i32
    %73 = tpu.assume_multiple %72, 8 : i32
    %74 = arith.index_cast %73 : i32 to index
    %c0_25 = arith.constant 0 : index
    %75 = vector.load %arg9[%74, %c0_25] : memref<64x512xf32, #tpu.memory_space<vmem>>, vector<8x512xf32>
    %cst_26 = arith.constant dense<0.000000e+00> : vector<8x512xf32>
    %76 = tpu.matmul %71, %7, %cst_26 {dimension_numbers = #tpu.dot_dimension_numbers<[1], [0], [0], [1], [0, 0, 1, 1], [], []>} : vector<8x128xf32>, vector<128x512xf32>, vector<8x512xf32> -> vector<8x512xf32>
    %77 = arith.addf %75, %76 : vector<8x512xf32>
    %78 = vector.extract_strided_slice %77 {offsets = [0, 0], sizes = [8, 128], strides = [1, 1]} : vector<8x512xf32> to vector<8x128xf32>
    %79 = arith.negf %78 : vector<8x128xf32>
    %80 = math.exp %79 : vector<8x128xf32>
    %cst_27 = arith.constant 1.000000e+00 : f32
    %81 = vector.broadcast %cst_27 : f32 to vector<8x128xf32>
    %82 = arith.addf %81, %80 : vector<8x128xf32>
    %83 = arith.divf %81, %82 : vector<8x128xf32>
    %84 = vector.extract_strided_slice %77 {offsets = [0, 128], sizes = [8, 128], strides = [1, 1]} : vector<8x512xf32> to vector<8x128xf32>
    %85 = arith.negf %84 : vector<8x128xf32>
    %86 = math.exp %85 : vector<8x128xf32>
    %cst_28 = arith.constant 1.000000e+00 : f32
    %87 = vector.broadcast %cst_28 : f32 to vector<8x128xf32>
    %88 = arith.addf %87, %86 : vector<8x128xf32>
    %89 = arith.divf %87, %88 : vector<8x128xf32>
    %90 = vector.extract_strided_slice %77 {offsets = [0, 256], sizes = [8, 128], strides = [1, 1]} : vector<8x512xf32> to vector<8x128xf32>
    %91 = math.tanh %90 : vector<8x128xf32>
    %92 = vector.extract_strided_slice %77 {offsets = [0, 384], sizes = [8, 128], strides = [1, 1]} : vector<8x512xf32> to vector<8x128xf32>
    %93 = arith.negf %92 : vector<8x128xf32>
    %94 = math.exp %93 : vector<8x128xf32>
    %cst_29 = arith.constant 1.000000e+00 : f32
    %95 = vector.broadcast %cst_29 : f32 to vector<8x128xf32>
    %96 = arith.addf %95, %94 : vector<8x128xf32>
    %97 = arith.divf %95, %96 : vector<8x128xf32>
    %98 = arith.mulf %89, %69 : vector<8x128xf32>
    %99 = arith.mulf %83, %91 : vector<8x128xf32>
    %100 = arith.addf %98, %99 : vector<8x128xf32>
    %101 = math.tanh %100 : vector<8x128xf32>
    %102 = arith.mulf %97, %101 : vector<8x128xf32>
    %c3_i32 = arith.constant 3 : i32
    %c8_i32_30 = arith.constant 8 : i32
    %103 = arith.muli %c3_i32, %c8_i32_30 : i32
    %104 = tpu.assume_multiple %103, 8 : i32
    %105 = arith.index_cast %104 : i32 to index
    %c0_31 = arith.constant 0 : index
    %106 = vector.load %arg9[%105, %c0_31] : memref<64x512xf32, #tpu.memory_space<vmem>>, vector<8x512xf32>
    %cst_32 = arith.constant dense<0.000000e+00> : vector<8x512xf32>
    %107 = tpu.matmul %102, %7, %cst_32 {dimension_numbers = #tpu.dot_dimension_numbers<[1], [0], [0], [1], [0, 0, 1, 1], [], []>} : vector<8x128xf32>, vector<128x512xf32>, vector<8x512xf32> -> vector<8x512xf32>
    %108 = arith.addf %106, %107 : vector<8x512xf32>
    %109 = vector.extract_strided_slice %108 {offsets = [0, 0], sizes = [8, 128], strides = [1, 1]} : vector<8x512xf32> to vector<8x128xf32>
    %110 = arith.negf %109 : vector<8x128xf32>
    %111 = math.exp %110 : vector<8x128xf32>
    %cst_33 = arith.constant 1.000000e+00 : f32
    %112 = vector.broadcast %cst_33 : f32 to vector<8x128xf32>
    %113 = arith.addf %112, %111 : vector<8x128xf32>
    %114 = arith.divf %112, %113 : vector<8x128xf32>
    %115 = vector.extract_strided_slice %108 {offsets = [0, 128], sizes = [8, 128], strides = [1, 1]} : vector<8x512xf32> to vector<8x128xf32>
    %116 = arith.negf %115 : vector<8x128xf32>
    %117 = math.exp %116 : vector<8x128xf32>
    %cst_34 = arith.constant 1.000000e+00 : f32
    %118 = vector.broadcast %cst_34 : f32 to vector<8x128xf32>
    %119 = arith.addf %118, %117 : vector<8x128xf32>
    %120 = arith.divf %118, %119 : vector<8x128xf32>
    %121 = vector.extract_strided_slice %108 {offsets = [0, 256], sizes = [8, 128], strides = [1, 1]} : vector<8x512xf32> to vector<8x128xf32>
    %122 = math.tanh %121 : vector<8x128xf32>
    %123 = vector.extract_strided_slice %108 {offsets = [0, 384], sizes = [8, 128], strides = [1, 1]} : vector<8x512xf32> to vector<8x128xf32>
    %124 = arith.negf %123 : vector<8x128xf32>
    %125 = math.exp %124 : vector<8x128xf32>
    %cst_35 = arith.constant 1.000000e+00 : f32
    %126 = vector.broadcast %cst_35 : f32 to vector<8x128xf32>
    %127 = arith.addf %126, %125 : vector<8x128xf32>
    %128 = arith.divf %126, %127 : vector<8x128xf32>
    %129 = arith.mulf %120, %100 : vector<8x128xf32>
    %130 = arith.mulf %114, %122 : vector<8x128xf32>
    %131 = arith.addf %129, %130 : vector<8x128xf32>
    %132 = math.tanh %131 : vector<8x128xf32>
    %133 = arith.mulf %128, %132 : vector<8x128xf32>
    %c4_i32 = arith.constant 4 : i32
    %c8_i32_36 = arith.constant 8 : i32
    %134 = arith.muli %c4_i32, %c8_i32_36 : i32
    %135 = tpu.assume_multiple %134, 8 : i32
    %136 = arith.index_cast %135 : i32 to index
    %c0_37 = arith.constant 0 : index
    %137 = vector.load %arg9[%136, %c0_37] : memref<64x512xf32, #tpu.memory_space<vmem>>, vector<8x512xf32>
    %cst_38 = arith.constant dense<0.000000e+00> : vector<8x512xf32>
    %138 = tpu.matmul %133, %7, %cst_38 {dimension_numbers = #tpu.dot_dimension_numbers<[1], [0], [0], [1], [0, 0, 1, 1], [], []>} : vector<8x128xf32>, vector<128x512xf32>, vector<8x512xf32> -> vector<8x512xf32>
    %139 = arith.addf %137, %138 : vector<8x512xf32>
    %140 = vector.extract_strided_slice %139 {offsets = [0, 0], sizes = [8, 128], strides = [1, 1]} : vector<8x512xf32> to vector<8x128xf32>
    %141 = arith.negf %140 : vector<8x128xf32>
    %142 = math.exp %141 : vector<8x128xf32>
    %cst_39 = arith.constant 1.000000e+00 : f32
    %143 = vector.broadcast %cst_39 : f32 to vector<8x128xf32>
    %144 = arith.addf %143, %142 : vector<8x128xf32>
    %145 = arith.divf %143, %144 : vector<8x128xf32>
    %146 = vector.extract_strided_slice %139 {offsets = [0, 128], sizes = [8, 128], strides = [1, 1]} : vector<8x512xf32> to vector<8x128xf32>
    %147 = arith.negf %146 : vector<8x128xf32>
    %148 = math.exp %147 : vector<8x128xf32>
    %cst_40 = arith.constant 1.000000e+00 : f32
    %149 = vector.broadcast %cst_40 : f32 to vector<8x128xf32>
    %150 = arith.addf %149, %148 : vector<8x128xf32>
    %151 = arith.divf %149, %150 : vector<8x128xf32>
    %152 = vector.extract_strided_slice %139 {offsets = [0, 256], sizes = [8, 128], strides = [1, 1]} : vector<8x512xf32> to vector<8x128xf32>
    %153 = math.tanh %152 : vector<8x128xf32>
    %154 = vector.extract_strided_slice %139 {offsets = [0, 384], sizes = [8, 128], strides = [1, 1]} : vector<8x512xf32> to vector<8x128xf32>
    %155 = arith.negf %154 : vector<8x128xf32>
    %156 = math.exp %155 : vector<8x128xf32>
    %cst_41 = arith.constant 1.000000e+00 : f32
    %157 = vector.broadcast %cst_41 : f32 to vector<8x128xf32>
    %158 = arith.addf %157, %156 : vector<8x128xf32>
    %159 = arith.divf %157, %158 : vector<8x128xf32>
    %160 = arith.mulf %151, %131 : vector<8x128xf32>
    %161 = arith.mulf %145, %153 : vector<8x128xf32>
    %162 = arith.addf %160, %161 : vector<8x128xf32>
    %163 = math.tanh %162 : vector<8x128xf32>
    %164 = arith.mulf %159, %163 : vector<8x128xf32>
    %c5_i32 = arith.constant 5 : i32
    %c8_i32_42 = arith.constant 8 : i32
    %165 = arith.muli %c5_i32, %c8_i32_42 : i32
    %166 = tpu.assume_multiple %165, 8 : i32
    %167 = arith.index_cast %166 : i32 to index
    %c0_43 = arith.constant 0 : index
    %168 = vector.load %arg9[%167, %c0_43] : memref<64x512xf32, #tpu.memory_space<vmem>>, vector<8x512xf32>
    %cst_44 = arith.constant dense<0.000000e+00> : vector<8x512xf32>
    %169 = tpu.matmul %164, %7, %cst_44 {dimension_numbers = #tpu.dot_dimension_numbers<[1], [0], [0], [1], [0, 0, 1, 1], [], []>} : vector<8x128xf32>, vector<128x512xf32>, vector<8x512xf32> -> vector<8x512xf32>
    %170 = arith.addf %168, %169 : vector<8x512xf32>
    %171 = vector.extract_strided_slice %170 {offsets = [0, 0], sizes = [8, 128], strides = [1, 1]} : vector<8x512xf32> to vector<8x128xf32>
    %172 = arith.negf %171 : vector<8x128xf32>
    %173 = math.exp %172 : vector<8x128xf32>
    %cst_45 = arith.constant 1.000000e+00 : f32
    %174 = vector.broadcast %cst_45 : f32 to vector<8x128xf32>
    %175 = arith.addf %174, %173 : vector<8x128xf32>
    %176 = arith.divf %174, %175 : vector<8x128xf32>
    %177 = vector.extract_strided_slice %170 {offsets = [0, 128], sizes = [8, 128], strides = [1, 1]} : vector<8x512xf32> to vector<8x128xf32>
    %178 = arith.negf %177 : vector<8x128xf32>
    %179 = math.exp %178 : vector<8x128xf32>
    %cst_46 = arith.constant 1.000000e+00 : f32
    %180 = vector.broadcast %cst_46 : f32 to vector<8x128xf32>
    %181 = arith.addf %180, %179 : vector<8x128xf32>
    %182 = arith.divf %180, %181 : vector<8x128xf32>
    %183 = vector.extract_strided_slice %170 {offsets = [0, 256], sizes = [8, 128], strides = [1, 1]} : vector<8x512xf32> to vector<8x128xf32>
    %184 = math.tanh %183 : vector<8x128xf32>
    %185 = vector.extract_strided_slice %170 {offsets = [0, 384], sizes = [8, 128], strides = [1, 1]} : vector<8x512xf32> to vector<8x128xf32>
    %186 = arith.negf %185 : vector<8x128xf32>
    %187 = math.exp %186 : vector<8x128xf32>
    %cst_47 = arith.constant 1.000000e+00 : f32
    %188 = vector.broadcast %cst_47 : f32 to vector<8x128xf32>
    %189 = arith.addf %188, %187 : vector<8x128xf32>
    %190 = arith.divf %188, %189 : vector<8x128xf32>
    %191 = arith.mulf %182, %162 : vector<8x128xf32>
    %192 = arith.mulf %176, %184 : vector<8x128xf32>
    %193 = arith.addf %191, %192 : vector<8x128xf32>
    %194 = math.tanh %193 : vector<8x128xf32>
    %195 = arith.mulf %190, %194 : vector<8x128xf32>
    %c6_i32 = arith.constant 6 : i32
    %c8_i32_48 = arith.constant 8 : i32
    %196 = arith.muli %c6_i32, %c8_i32_48 : i32
    %197 = tpu.assume_multiple %196, 8 : i32
    %198 = arith.index_cast %197 : i32 to index
    %c0_49 = arith.constant 0 : index
    %199 = vector.load %arg9[%198, %c0_49] : memref<64x512xf32, #tpu.memory_space<vmem>>, vector<8x512xf32>
    %cst_50 = arith.constant dense<0.000000e+00> : vector<8x512xf32>
    %200 = tpu.matmul %195, %7, %cst_50 {dimension_numbers = #tpu.dot_dimension_numbers<[1], [0], [0], [1], [0, 0, 1, 1], [], []>} : vector<8x128xf32>, vector<128x512xf32>, vector<8x512xf32> -> vector<8x512xf32>
    %201 = arith.addf %199, %200 : vector<8x512xf32>
    %202 = vector.extract_strided_slice %201 {offsets = [0, 0], sizes = [8, 128], strides = [1, 1]} : vector<8x512xf32> to vector<8x128xf32>
    %203 = arith.negf %202 : vector<8x128xf32>
    %204 = math.exp %203 : vector<8x128xf32>
    %cst_51 = arith.constant 1.000000e+00 : f32
    %205 = vector.broadcast %cst_51 : f32 to vector<8x128xf32>
    %206 = arith.addf %205, %204 : vector<8x128xf32>
    %207 = arith.divf %205, %206 : vector<8x128xf32>
    %208 = vector.extract_strided_slice %201 {offsets = [0, 128], sizes = [8, 128], strides = [1, 1]} : vector<8x512xf32> to vector<8x128xf32>
    %209 = arith.negf %208 : vector<8x128xf32>
    %210 = math.exp %209 : vector<8x128xf32>
    %cst_52 = arith.constant 1.000000e+00 : f32
    %211 = vector.broadcast %cst_52 : f32 to vector<8x128xf32>
    %212 = arith.addf %211, %210 : vector<8x128xf32>
    %213 = arith.divf %211, %212 : vector<8x128xf32>
    %214 = vector.extract_strided_slice %201 {offsets = [0, 256], sizes = [8, 128], strides = [1, 1]} : vector<8x512xf32> to vector<8x128xf32>
    %215 = math.tanh %214 : vector<8x128xf32>
    %216 = vector.extract_strided_slice %201 {offsets = [0, 384], sizes = [8, 128], strides = [1, 1]} : vector<8x512xf32> to vector<8x128xf32>
    %217 = arith.negf %216 : vector<8x128xf32>
    %218 = math.exp %217 : vector<8x128xf32>
    %cst_53 = arith.constant 1.000000e+00 : f32
    %219 = vector.broadcast %cst_53 : f32 to vector<8x128xf32>
    %220 = arith.addf %219, %218 : vector<8x128xf32>
    %221 = arith.divf %219, %220 : vector<8x128xf32>
    %222 = arith.mulf %213, %193 : vector<8x128xf32>
    %223 = arith.mulf %207, %215 : vector<8x128xf32>
    %224 = arith.addf %222, %223 : vector<8x128xf32>
    %225 = math.tanh %224 : vector<8x128xf32>
    %226 = arith.mulf %221, %225 : vector<8x128xf32>
    %c7_i32 = arith.constant 7 : i32
    %c8_i32_54 = arith.constant 8 : i32
    %227 = arith.muli %c7_i32, %c8_i32_54 : i32
    %228 = tpu.assume_multiple %227, 8 : i32
    %229 = arith.index_cast %228 : i32 to index
    %c0_55 = arith.constant 0 : index
    %230 = vector.load %arg9[%229, %c0_55] : memref<64x512xf32, #tpu.memory_space<vmem>>, vector<8x512xf32>
    %cst_56 = arith.constant dense<0.000000e+00> : vector<8x512xf32>
    %231 = tpu.matmul %226, %7, %cst_56 {dimension_numbers = #tpu.dot_dimension_numbers<[1], [0], [0], [1], [0, 0, 1, 1], [], []>} : vector<8x128xf32>, vector<128x512xf32>, vector<8x512xf32> -> vector<8x512xf32>
    %232 = arith.addf %230, %231 : vector<8x512xf32>
    %233 = vector.extract_strided_slice %232 {offsets = [0, 0], sizes = [8, 128], strides = [1, 1]} : vector<8x512xf32> to vector<8x128xf32>
    %234 = arith.negf %233 : vector<8x128xf32>
    %235 = math.exp %234 : vector<8x128xf32>
    %cst_57 = arith.constant 1.000000e+00 : f32
    %236 = vector.broadcast %cst_57 : f32 to vector<8x128xf32>
    %237 = arith.addf %236, %235 : vector<8x128xf32>
    %238 = arith.divf %236, %237 : vector<8x128xf32>
    %239 = vector.extract_strided_slice %232 {offsets = [0, 128], sizes = [8, 128], strides = [1, 1]} : vector<8x512xf32> to vector<8x128xf32>
    %240 = arith.negf %239 : vector<8x128xf32>
    %241 = math.exp %240 : vector<8x128xf32>
    %cst_58 = arith.constant 1.000000e+00 : f32
    %242 = vector.broadcast %cst_58 : f32 to vector<8x128xf32>
    %243 = arith.addf %242, %241 : vector<8x128xf32>
    %244 = arith.divf %242, %243 : vector<8x128xf32>
    %245 = vector.extract_strided_slice %232 {offsets = [0, 256], sizes = [8, 128], strides = [1, 1]} : vector<8x512xf32> to vector<8x128xf32>
    %246 = math.tanh %245 : vector<8x128xf32>
    %247 = vector.extract_strided_slice %232 {offsets = [0, 384], sizes = [8, 128], strides = [1, 1]} : vector<8x512xf32> to vector<8x128xf32>
    %248 = arith.negf %247 : vector<8x128xf32>
    %249 = math.exp %248 : vector<8x128xf32>
    %cst_59 = arith.constant 1.000000e+00 : f32
    %250 = vector.broadcast %cst_59 : f32 to vector<8x128xf32>
    %251 = arith.addf %250, %249 : vector<8x128xf32>
    %252 = arith.divf %250, %251 : vector<8x128xf32>
    %253 = arith.mulf %244, %224 : vector<8x128xf32>
    %254 = arith.mulf %238, %246 : vector<8x128xf32>
    %255 = arith.addf %253, %254 : vector<8x128xf32>
    %256 = math.tanh %255 : vector<8x128xf32>
    %257 = arith.mulf %252, %256 : vector<8x128xf32>
    %c8_i32_60 = arith.constant 8 : i32
    %c0_61 = arith.constant 0 : index
    %c0_62 = arith.constant 0 : index
    %258 = vector.load %arg4[%c0_61, %c0_62] : memref<128x3xf32, #tpu.memory_space<vmem>>, vector<128x3xf32>
    %cst_63 = arith.constant dense<0.000000e+00> : vector<8x3xf32>
    %259 = tpu.matmul %257, %258, %cst_63 {dimension_numbers = #tpu.dot_dimension_numbers<[1], [0], [0], [1], [0, 0, 1, 1], [], []>} : vector<8x128xf32>, vector<128x3xf32>, vector<8x3xf32> -> vector<8x3xf32>
    %c0_64 = arith.constant 0 : index
    %c0_65 = arith.constant 0 : index
    %260 = vector.load %arg5[%c0_64, %c0_65] : memref<1x3xf32, #tpu.memory_space<vmem>>, vector<1x3xf32>
    %261 = vector.broadcast %260 : vector<1x3xf32> to vector<8x3xf32>
    %262 = arith.addf %259, %261 : vector<8x3xf32>
    %c0_66 = arith.constant 0 : index
    %c0_67 = arith.constant 0 : index
    %263 = vector.load %arg8[%c0_66, %c0_67] : memref<8x3xf32, #tpu.memory_space<vmem>>, vector<8x3xf32>
    tpu.vector_store %arg8[%c0_66, %c0_67], %262 {strides = array<i32>} : memref<8x3xf32, #tpu.memory_space<vmem>>, vector<8x3xf32>,
    return
  }
}

</mosaic_0001>

<bundles_post_ra>
// kernel: tpu_custom_call.1
= control target key start
LH: loop header
LB: loop body
LE: loop exit
PB: predicated region body
PF: predicated region fallthrough
CT: control target
= control target key end

     0   :  { %13 = vsyncpa [#allocation4], 0  ;;  %s2800_s27 = smov [#allocation3]   ;;  %s3399_s0 = inlined_call_operand.vmem [shape: f32[64,8], index: 0, kind: input, shape index: {}]   ;;  %s3400_s1 = inlined_call_operand.vmem [shape: f32[8,512], index: 1, kind: input, shape index: {}]   ;;  %s3401_s2 = inlined_call_operand.hbm [shape: f32[128,512], index: 2, kind: input, shape index: {}]   ;;  %s3402_s3 = inlined_call_operand.vmem [shape: f32[1,512], index: 3, kind: input, shape index: {}]   ;;  %s3403_s4 = inlined_call_operand.vmem [shape: f32[128,3], index: 4, kind: input, shape index: {}]   ;;  %s3404_s5 = inlined_call_operand.vmem [shape: f32[1,3], index: 5, kind: input, shape index: {}]   ;;  %s3405_s6 = inlined_call_operand.vmem [shape: f32[8,128], index: 6, kind: input, shape index: {}]   ;;  %s3406_s7 = inlined_call_operand.vmem [shape: f32[8,128], index: 7, kind: input, shape index: {}]   ;;  %s3407_s8 = inlined_call_operand.vmem [shape: f32[8,3], index: 8, kind: output, shape index: {}]  }
   0x1   :  { %s23_s28 = sshll.u32 %s2800_s27, 4  ;;  %s2776_s9 = scalar_lea.hbm %s3401_s2, 8192  ;;  %s24_s28 = int_to_ptr.vmem [resolvable:$true] %s23_s28 }
   0x2   :  { %p2777_p0 = scmp.ne.s32.totalorder %s3401_s2, %s2776_s9  ;;  %p2780_p1 = scmp.lt.u32.totalorder %s2776_s9, %s3401_s2 }
   0x4   :  { %p2782_p2 = pnand %p2780_p1, %p2777_p0 }
   0x6   :  { %2785 = shalt.err (!%p2782_p2)
}
   0x7   :  { %s2786_s14 = scalar_lea.vmem %s24_s28, 8192  ;;  %p2791_p4 = scmp.lt.s32.totalorder %s24_s28, %s24_s28 }
   0x8   :  { %p2787_p3 = scmp.ne.s32.totalorder %s24_s28, %s2786_s14  ;;  %p2792_p5 = scmp.lt.s32.totalorder %s2786_s14, %s2786_s14 }
   0xa   :  { %p2793_p6 = por %p2792_p5, %p2791_p4 }
   0xc   :  { %p2794_p7 = pnand %p2793_p6, %p2787_p3 }
   0xe   :  { %2797 = shalt.err (!%p2794_p7)
}
   0xf   :  { %s2801_s15 = smov 512   ;;  %s2802_s16 = smov 32  }
  0x10   :  { %29 = dma.hbm_to_vmem [thread:$0]  %s3401_s2, 8192, %s24_s28, [#allocation4], %s2801_s15, %s2801_s15, %s2802_s16  }
  0x11   :  { %2798 = dma.done.wait [#allocation4], 8192  }
  0x12   :  { %2799 = vsyncadd [#allocation4], 4294959104  ;;  %v2803_v0 = vmov 0.0   ;;  %v52_v1 = vld [vmem:[%s3400_s1 + $0x8] sm:$0xff]  ;;  %v54_v2 = vld [vmem:[%s3400_s1 + $0x18] sm:$0xff]  ;;  %vm77_vm0 = vcmask 64512  }
  0x13   :  { %166 = vmatprep.mubr.f32.mxu0 %v2803_v0  ;;  %279 = vmatprep.mubr.f32.mxu1 %v2803_v0  ;;  %v51_v3 = vld [vmem:[%s3400_s1] sm:$0xff]  ;;  %v53_v4 = vld [vmem:[%s3400_s1 + $0x10] sm:$0xff]  ;;  %v361_v6 = vld [vmem:[#allocation3 + $0x8] sm:$0xff]  ;;  %vm2805_vm1 = vmmov 0   ;;  %vm1935_vm2 = vcmask 23552  }
  0x14   :  { %102 = vmatprep.subr.mxu0 %v52_v1  ;;  %215 = vmatprep.subr.mxu1 %v54_v2  ;;  %v43_v5 = vld [vmem:[%s3399_s0] sm:$0xff]  ;;  %v365_v7 = vld [vmem:[#allocation3 + $0x28] sm:$0xff]  ;;  %v363_v8 = vld [vmem:[#allocation3 + $0x18] sm:$0xff] }
  0x15   :  { %103 = vmatpush1.msra.mxu0 %v51_v3  ;;  %216 = vmatpush1.msra.mxu1 %v53_v4  ;;  %v367_v9 = vld [vmem:[#allocation3 + $0x38] sm:$0xff]  ;;  %v2882_v10 = vpack.c.bf16 %v365_v7, %v361_v6  ;;  %v360_v12 = vld [vmem:[#allocation3] sm:$0xff]  ;;  %v362_v14 = vld [vmem:[#allocation3 + $0x10] sm:$0xff] }
  0x16   :  { %1949 = vmatmul.mubr.msk.f32.vlgmr.msra.gmra.mrb[0].mxu0 %vm77_vm0, %v43_v5  ;;  %1957 = vmatmul.mubr.msk.f32.vlgmr.msra.gmra.mrb[0].mxu1 %vm77_vm0, %v43_v5  ;;  %v2884_v11 = vpack.c.bf16 %v367_v9, %v363_v8  ;;  %v364_v13 = vld [vmem:[#allocation3 + $0x20] sm:$0xff]  ;;  %v366_v16 = vld [vmem:[#allocation3 + $0x30] sm:$0xff]  ;;  %v44_v17 = vld [vmem:[%s3399_s0 + $0x8] sm:$0xff] }
  0x17   :  { %v2886_v15 = vpack.c.bf16 %v364_v13, %v360_v12  ;;  %172 = vmatprep.mubr.f32.mxu0 %v2803_v0  ;;  %285 = vmatprep.mubr.f32.mxu1 %v2803_v0  ;;  %v369_v18 = vld [vmem:[#allocation3 + $0x48] sm:$0xff]  ;;  %v2895_v19 = vpack.c.bf16 %v366_v16, %v362_v14  ;;  %v371_v21 = vld [vmem:[#allocation3 + $0x58] sm:$0xff]  ;;  %v368_v25 = vld [vmem:[#allocation3 + $0x40] sm:$0xff] }
  0x18   :  { %2043 = vmatprep.subr.bf16.mxu0 %v2882_v10  ;;  %2075 = vmatprep.subr.bf16.mxu1 %v2884_v11  ;;  %v373_v20 = vld [vmem:[#allocation3 + $0x68] sm:$0xff]  ;;  %v375_v22 = vld [vmem:[#allocation3 + $0x78] sm:$0xff]  ;;  %v372_v26 = vld [vmem:[#allocation3 + $0x60] sm:$0xff] }
  0x19   :  { %2045 = vmatpush1.bf16.msra.mxu0 %v2886_v15  ;;  %v2898_v23 = vpack.c.bf16 %v373_v20, %v369_v18  ;;  %v2900_v24 = vpack.c.bf16 %v375_v22, %v371_v21  ;;  %v370_v27 = vld [vmem:[#allocation3 + $0x50] sm:$0xff]  ;;  %2077 = vmatpush1.bf16.msra.mxu1 %v2895_v19  ;;  %v2904_v28 = vpack.c.bf16 %v372_v26, %v368_v25  ;;  %v377_v31 = vld [vmem:[#allocation3 + $0x88] sm:$0xff]  ;;  %v379_v34 = vld [vmem:[#allocation3 + $0x98] sm:$0xff] }
  0x1a   :  { %1950 = vmatmul.mubr.msk.f32.gmra.mrb[2].mxu0 %vm77_vm0, %v44_v17  ;;  %v374_v29 = vld [vmem:[#allocation3 + $0x70] sm:$0xff]  ;;  %1958 = vmatmul.mubr.msk.f32.gmra.mrb[2].mxu1 %vm77_vm0, %v44_v17  ;;  %v381_v33 = vld [vmem:[#allocation3 + $0xa8] sm:$0xff]  ;;  %v383_v35 = vld [vmem:[#allocation3 + $0xb8] sm:$0xff] }
  0x1b   :  { %v45_v30 = vld [vmem:[%s3399_s0 + $0x10] sm:$0xff]  ;;  %2047 = vmatprep.subr.bf16.mxu0 %v2898_v23  ;;  %v2911_v32 = vpack.c.bf16 %v374_v29, %v370_v27  ;;  %2079 = vmatprep.subr.bf16.mxu1 %v2900_v24  ;;  %v2915_v36 = vpack.c.bf16 %v381_v33, %v377_v31  ;;  %v2917_v37 = vpack.c.bf16 %v383_v35, %v379_v34  ;;  %v376_v38 = vld [vmem:[#allocation3 + $0x80] sm:$0xff]  ;;  %v46_v43 = vld [vmem:[%s3399_s0 + $0x18] sm:$0xff] }
  0x1c   :  { %178 = vmatprep.mubr.f32.mxu0 %v2803_v0  ;;  %v380_v39 = vld [vmem:[#allocation3 + $0xa0] sm:$0xff]  ;;  %v378_v40 = vld [vmem:[#allocation3 + $0x90] sm:$0xff]  ;;  %291 = vmatprep.mubr.f32.mxu1 %v2803_v0  ;;  %v385_v44 = vld [vmem:[#allocation3 + $0xc8] sm:$0xff] }
  0x1d   :  { %2049 = vmatpush1.bf16.msra.mxu0 %v2904_v28  ;;  %v2921_v41 = vpack.c.bf16 %v380_v39, %v376_v38  ;;  %v382_v42 = vld [vmem:[#allocation3 + $0xb0] sm:$0xff]  ;;  %2081 = vmatpush1.bf16.msra.mxu1 %v2911_v32  ;;  %v389_v46 = vld [vmem:[#allocation3 + $0xe8] sm:$0xff]  ;;  %v387_v47 = vld [vmem:[#allocation3 + $0xd8] sm:$0xff] }
  0x1e   :  { %1951 = vmatmul.mubr.msk.f32.gmra.mrb[4].mxu0 %vm77_vm0, %v45_v30  ;;  %v2928_v45 = vpack.c.bf16 %v382_v42, %v378_v40  ;;  %v391_v48 = vld [vmem:[#allocation3 + $0xf8] sm:$0xff]  ;;  %1959 = vmatmul.mubr.msk.f32.gmra.mrb[4].mxu1 %vm77_vm0, %v45_v30  ;;  %v2932_v49 = vpack.c.bf16 %v389_v46, %v385_v44  ;;  %v384_v50 = vld [vmem:[#allocation3 + $0xc0] sm:$0xff]  ;;  %v386_v52 = vld [vmem:[#allocation3 + $0xd0] sm:$0xff] }
  0x1f   :  { %2051 = vmatprep.subr.bf16.mxu0 %v2915_v36  ;;  %v388_v51 = vld [vmem:[#allocation3 + $0xe0] sm:$0xff]  ;;  %2083 = vmatprep.subr.bf16.mxu1 %v2917_v37  ;;  %v2936_v53 = vpack.c.bf16 %v391_v48, %v387_v47  ;;  %v390_v54 = vld [vmem:[#allocation3 + $0xf0] sm:$0xff]  ;;  %v393_v55 = vld [vmem:[#allocation3 + $0x108] sm:$0xff] }
  0x20   :  { %184 = vmatprep.mubr.f32.mxu0 %v2803_v0  ;;  %297 = vmatprep.mubr.f32.mxu1 %v2803_v0  ;;  %v2940_v56 = vpack.c.bf16 %v388_v51, %v384_v50  ;;  %v397_v57 = vld [vmem:[#allocation3 + $0x128] sm:$0xff]  ;;  %v395_v58 = vld [vmem:[#allocation3 + $0x118] sm:$0xff]  ;;  %v2944_v60 = vpack.c.bf16 %v390_v54, %v386_v52  ;;  %v392_v61 = vld [vmem:[#allocation3 + $0x100] sm:$0xff] }
  0x21   :  { %2053 = vmatpush1.bf16.msra.mxu0 %v2921_v41  ;;  %v399_v59 = vld [vmem:[#allocation3 + $0x138] sm:$0xff]  ;;  %2085 = vmatpush1.bf16.msra.mxu1 %v2928_v45  ;;  %v396_v62 = vld [vmem:[#allocation3 + $0x120] sm:$0xff]  ;;  %v2951_v1 = vpack.c.bf16 %v397_v57, %v393_v55  ;;  %v394_v2 = vld [vmem:[#allocation3 + $0x110] sm:$0xff] }
  0x22   :  { %1952 = vmatmul.mubr.msk.f32.gmra.mrb[6].mxu0 %vm77_vm0, %v46_v43  ;;  %1960 = vmatmul.mubr.msk.f32.gmra.mrb[6].mxu1 %vm77_vm0, %v46_v43  ;;  %v47_v63 = vld [vmem:[%s3399_s0 + $0x20] sm:$0xff]  ;;  %v398_v3 = vld [vmem:[#allocation3 + $0x130] sm:$0xff]  ;;  %v2955_v4 = vpack.c.bf16 %v399_v59, %v395_v58  ;;  %v401_v5 = vld [vmem:[#allocation3 + $0x148] sm:$0xff]  ;;  %v2959_v7 = vpack.c.bf16 %v396_v62, %v392_v61 }
  0x23   :  { %2055 = vmatprep.subr.bf16.mxu0 %v2932_v49  ;;  %2087 = vmatprep.subr.bf16.mxu1 %v2936_v53  ;;  %v405_v6 = vld [vmem:[#allocation3 + $0x168] sm:$0xff]  ;;  %v403_v8 = vld [vmem:[#allocation3 + $0x158] sm:$0xff]  ;;  %v2963_v12 = vpack.c.bf16 %v398_v3, %v394_v2  ;;  %v400_v13 = vld [vmem:[#allocation3 + $0x140] sm:$0xff] }
  0x24   :  { %190 = vmatprep.mubr.f32.mxu0 %v2803_v0  ;;  %303 = vmatprep.mubr.f32.mxu1 %v2803_v0  ;;  %v407_v9 = vld [vmem:[#allocation3 + $0x178] sm:$0xff]  ;;  %v404_v14 = vld [vmem:[#allocation3 + $0x160] sm:$0xff]  ;;  %v48_v16 = vld [vmem:[%s3399_s0 + $0x28] sm:$0xff]  ;;  %v2970_v17 = vpack.c.bf16 %v405_v6, %v401_v5 }
  0x25   :  { %2057 = vmatpush1.bf16.msra.mxu0 %v2940_v56  ;;  %2089 = vmatpush1.bf16.msra.mxu1 %v2944_v60  ;;  %v402_v18 = vld [vmem:[#allocation3 + $0x150] sm:$0xff]  ;;  %v2974_v21 = vpack.c.bf16 %v407_v9, %v403_v8  ;;  %v409_v22 = vld [vmem:[#allocation3 + $0x188] sm:$0xff]  ;;  %v2978_v26 = vpack.c.bf16 %v404_v14, %v400_v13  ;;  %v411_v27 = vld [vmem:[#allocation3 + $0x198] sm:$0xff] }
  0x26   :  { %1953 = vmatmul.mubr.msk.f32.gmra.mrb[8].mxu0 %vm77_vm0, %v47_v63  ;;  %1961 = vmatmul.mubr.msk.f32.gmra.mrb[8].mxu1 %vm77_vm0, %v47_v63  ;;  %v406_v20 = vld [vmem:[#allocation3 + $0x170] sm:$0xff]  ;;  %v413_v25 = vld [vmem:[#allocation3 + $0x1a8] sm:$0xff]  ;;  %v415_v29 = vld [vmem:[#allocation3 + $0x1b8] sm:$0xff]  ;;  %v57_v63 = vlaneseq }
  0x27   :  { %2059 = vmatprep.subr.bf16.mxu0 %v2951_v1  ;;  %2091 = vmatprep.subr.bf16.mxu1 %v2955_v4  ;;  %v2982_v30 = vpack.c.bf16 %v406_v20, %v402_v18  ;;  %v408_v31 = vld [vmem:[#allocation3 + $0x180] sm:$0xff]  ;;  %v49_v34 = vld [vmem:[%s3399_s0 + $0x30] sm:$0xff]  ;;  %v2989_v35 = vpack.c.bf16 %v413_v25, %v409_v22  ;;  %v2993_v40 = vpack.c.bf16 %v415_v29, %v411_v27  ;;  %v417_v42 = vld [vmem:[#allocation3 + $0x1c8] sm:$0xff] }
  0x28   :  { %196 = vmatprep.mubr.f32.mxu0 %v2803_v0  ;;  %309 = vmatprep.mubr.f32.mxu1 %v2803_v0  ;;  %v412_v33 = vld [vmem:[#allocation3 + $0x1a0] sm:$0xff]  ;;  %v410_v38 = vld [vmem:[#allocation3 + $0x190] sm:$0xff]  ;;  %v421_v43 = vld [vmem:[#allocation3 + $0x1e8] sm:$0xff]  ;;  %v58_v2 = vshrl.u32 %v57_v63, 7 }
  0x29   :  { %2061 = vmatpush1.bf16.msra.mxu0 %v2959_v7  ;;  %2093 = vmatpush1.bf16.msra.mxu1 %v2963_v12  ;;  %v414_v39 = vld [vmem:[#allocation3 + $0x1b0] sm:$0xff]  ;;  %v2997_v44 = vpack.c.bf16 %v412_v33, %v408_v31  ;;  %v419_v46 = vld [vmem:[#allocation3 + $0x1d8] sm:$0xff]  ;;  %v416_v50 = vld [vmem:[#allocation3 + $0x1c0] sm:$0xff]  ;;  %v3008_v54 = vpack.c.bf16 %v421_v43, %v417_v42 }
  0x2a   :  { %1954 = vmatmul.mubr.msk.f32.gmra.mrb[10].mxu0 %vm77_vm0, %v48_v16  ;;  %1962 = vmatmul.mubr.msk.f32.gmra.mrb[10].mxu1 %vm77_vm0, %v48_v16  ;;  %v423_v47 = vld [vmem:[#allocation3 + $0x1f8] sm:$0xff]  ;;  %v3001_v48 = vpack.c.bf16 %v414_v39, %v410_v38  ;;  %v420_v51 = vld [vmem:[#allocation3 + $0x1e0] sm:$0xff]  ;;  %v418_v55 = vld [vmem:[#allocation3 + $0x1d0] sm:$0xff]  ;;  %v59_v3 = vsub.s32 0, %v58_v2  ;;  %v63_v6 = vsub.s32 1, %v58_v2  ;;  %v71_v14 = vsub.s32 3, %v58_v2 }
  0x2b   :  { %2063 = vmatprep.subr.bf16.mxu0 %v2970_v17  ;;  %2095 = vmatprep.subr.bf16.mxu1 %v2974_v21  ;;  %v50_v52 = vld [vmem:[%s3399_s0 + $0x38] sm:$0xff]  ;;  %v422_v57 = vld [vmem:[#allocation3 + $0x1f0] sm:$0xff]  ;;  %v3012_v58 = vpack.c.bf16 %v423_v47, %v419_v46  ;;  %v3016_v59 = vpack.c.bf16 %v420_v51, %v416_v50  ;;  %v424_v62 = vld [vmem:[%s3405_s6] sm:$0xff]  ;;  %v67_v33 = vsub.s32 2, %v58_v2 }
  0x2c   :  { %202 = vmatprep.mubr.f32.mxu0 %v2803_v0  ;;  %315 = vmatprep.mubr.f32.mxu1 %v2803_v0  ;;  %v3020_v61 = vpack.c.bf16 %v422_v57, %v418_v55  ;;  %v55_v5 = vld [vmem:[%s3402_s3] sm:$0xf] }
  0x2d   :  { %2065 = vmatpush1.bf16.msra.mxu0 %v2978_v26  ;;  %2097 = vmatpush1.bf16.msra.mxu1 %v2982_v30  ;;  %v3071_v8 = vrot.slane %v55_v5, %v59_v3  ;;  %v3073_v9 = vrot.slane %v55_v5, %v63_v6  ;;  %v3077_v31 = vrot.slane %v55_v5, %v71_v14  ;;  %v425_v55 = vld [vmem:[%s3406_s7] sm:$0xff] }
  0x2e   :  { %1955 = vmatmul.mubr.msk.f32.gmra.mrb[12].mxu0 %vm77_vm0, %v49_v34  ;;  %1963 = vmatmul.mubr.msk.f32.gmra.mrb[12].mxu1 %vm77_vm0, %v49_v34  ;;  %v3080_v38 = vrot.slane %v55_v5, %v67_v33 }
  0x2f   :  { %2067 = vmatprep.subr.bf16.mxu0 %v2989_v35  ;;  %2099 = vmatprep.subr.bf16.mxu1 %v2993_v40 }
  0x30   :  { %208 = vmatprep.mubr.f32.mxu0 %v2803_v0  ;;  %321 = vmatprep.mubr.f32.mxu1 %v2803_v0 }
  0x31   :  { %2069 = vmatpush1.bf16.msra.mxu0 %v2997_v44  ;;  %2101 = vmatpush1.bf16.msra.mxu1 %v3001_v48 }
  0x32   :  { %1956 = vmatmul.mubr.msk.f32.gmra.mrb[14].mxu0 %vm77_vm0, %v50_v52  ;;  %1964 = vmatmul.mubr.msk.f32.gmra.mrb[14].mxu1 %vm77_vm0, %v50_v52 }
  0x33   :  { %2071 = vmatprep.subr.bf16.mxu0 %v3008_v54  ;;  %2103 = vmatprep.subr.bf16.mxu1 %v3012_v58 }
  0x34   :  { %497 = vmatprep.mubr.f32.mxu0 %v2803_v0  ;;  %568 = vmatprep.mubr.f32.mxu1 %v2803_v0 }
  0x35   :  { %2073 = vmatpush1.bf16.msra.mxu0 %v3016_v59  ;;  %2105 = vmatpush1.bf16.msra.mxu1 %v3020_v61 }
  0x36   :  { %2107 = vmatprep.subr.bf16.mxu0 %v2882_v10  ;;  %2139 = vmatprep.subr.bf16.mxu1 %v2884_v11 }
  0x38   :  { %498 = vmatmul.mubr.f32.vlgmr.msra.gmra.mrb[0].mxu0 %v424_v62  ;;  %569 = vmatmul.mubr.f32.vlgmr.msra.gmra.mrb[0].mxu1 %v424_v62 }
  0x39   :  { %2109 = vmatpush1.bf16.msra.mxu0 %v2886_v15  ;;  %2141 = vmatpush1.bf16.msra.mxu1 %v2895_v19 }
  0x3a   :  { %2111 = vmatprep.subr.bf16.mxu0 %v2898_v23  ;;  %2143 = vmatprep.subr.bf16.mxu1 %v2900_v24 }
  0x3b   :  { %674 = vmatprep.mubr.f32.mxu0 %v2803_v0  ;;  %745 = vmatprep.mubr.f32.mxu1 %v2803_v0 }
  0x3d   :  { %2113 = vmatpush1.bf16.msra.mxu0 %v2904_v28  ;;  %2145 = vmatpush1.bf16.msra.mxu1 %v2911_v32 }
  0x3e   :  { %2115 = vmatprep.subr.bf16.mxu0 %v2915_v36  ;;  %2147 = vmatprep.subr.bf16.mxu1 %v2917_v37 }
  0x41   :  { %2117 = vmatpush1.bf16.msra.mxu0 %v2921_v41  ;;  %2149 = vmatpush1.bf16.msra.mxu1 %v2928_v45 }
  0x42   :  { %2119 = vmatprep.subr.bf16.mxu0 %v2932_v49  ;;  %2151 = vmatprep.subr.bf16.mxu1 %v2936_v53 }
  0x45   :  { %2121 = vmatpush1.bf16.msra.mxu0 %v2940_v56  ;;  %2153 = vmatpush1.bf16.msra.mxu1 %v2944_v60 }
  0x46   :  { %2123 = vmatprep.subr.bf16.mxu0 %v2951_v1  ;;  %2155 = vmatprep.subr.bf16.mxu1 %v2955_v4 }
  0x49   :  { %2125 = vmatpush1.bf16.msra.mxu0 %v2959_v7  ;;  %2157 = vmatpush1.bf16.msra.mxu1 %v2963_v12 }
  0x4a   :  { %2127 = vmatprep.subr.bf16.mxu0 %v2970_v17  ;;  %2159 = vmatprep.subr.bf16.mxu1 %v2974_v21 }
  0x4d   :  { %2129 = vmatpush1.bf16.msra.mxu0 %v2978_v26  ;;  %2161 = vmatpush1.bf16.msra.mxu1 %v2982_v30 }
  0x4e   :  { %2131 = vmatprep.subr.bf16.mxu0 %v2989_v35  ;;  %2163 = vmatprep.subr.bf16.mxu1 %v2993_v40 }
  0x51   :  { %2133 = vmatpush1.bf16.msra.mxu0 %v2997_v44  ;;  %2165 = vmatpush1.bf16.msra.mxu1 %v3001_v48 }
  0x52   :  { %2135 = vmatprep.subr.bf16.mxu0 %v3008_v54  ;;  %2167 = vmatprep.subr.bf16.mxu1 %v3012_v58 }
  0x55   :  { %2137 = vmatpush1.bf16.msra.mxu0 %v3016_v59  ;;  %2169 = vmatpush1.bf16.msra.mxu1 %v3020_v61 }
  0x56   :  { %2171 = vmatprep.subr.bf16.mxu0 %v2882_v10  ;;  %2203 = vmatprep.subr.bf16.mxu1 %v2884_v11 }
 0x10b   :  { %v499_v13 = vpop.f32.mrb[0].mxu0  ;;  %v570_v18 = vpop.f32.mrb[0].mxu1 }
 0x10c   :  { %v2578_v16 = vadd.f32 %v499_v13, %v3071_v8  ;;  %v501_v20 = vpop.f32.mrb[1].mxu0  ;;  %v572_v25 = vpop.f32.mrb[1].mxu1  ;;  %v2594_v42 = vadd.f32 %v570_v18, %v3080_v38 }
 0x10d   :  { %v2579_v22 = vadd.f32 %v501_v20, %v3073_v9  ;;  %v2595_v34 = vadd.f32 %v572_v25, %v3077_v31 }
 0x10e   :  { %v1965_v27 = vmul.f32 -1.442695, %v2578_v16 }
 0x10f   :  { %v1966_v29 = vmul.f32 -1.442695, %v2579_v22  ;;  %v1967_v39 = vmul.f32 -1.442695, %v2595_v34 }
 0x110   :  { %2648 = vpow2.f32 %v1965_v27 }
 0x111   :  { %2650 = vpow2.f32 %v1966_v29 }
 0x112   :  { %2652 = vpow2.f32 %v1967_v39 }
 0x113   :  { %2654 = vtanh.f32 %v2594_v42 }
 0x11a   :  { %v2649_v43 = vpop.eup %2648 }
 0x11b   :  { %v2651_v46 = vpop.eup %2650  ;;  %v582_v47 = vadd.f32 1.0, %v2649_v43 }
 0x11c   :  { %v588_v50 = vadd.f32 1.0, %v2651_v46  ;;  %v2653_v51 = vpop.eup %2652 }
 0x11d   :  { %2656 = vrcp.f32 %v582_v47  ;;  %v2655_v52 = vpop.eup %2654  ;;  %v595_v2 = vadd.f32 1.0, %v2653_v51 }
 0x11e   :  { %2658 = vrcp.f32 %v588_v50 }
 0x11f   :  { %2660 = vrcp.f32 %v595_v2 }
 0x127   :  { %v2657_v57 = vpop.eup %2656 }
 0x128   :  { %v2659_v62 = vpop.eup %2658  ;;  %v599_v63 = vmul.f32 %v2657_v57, %v2655_v52 }
 0x129   :  { %v598_v3 = vmul.f32 %v2659_v62, %v425_v55  ;;  %v2661_v6 = vpop.eup %2660 }
 0x12b   :  { %v3086_v5 = vadd.f32 %v599_v63, %v598_v3 }
 0x12d   :  { %2662 = vtanh.f32 %v3086_v5 }
 0x137   :  { %v2663_v13 = vpop.eup %2662 }
 0x138   :  { %v602_v14 = vmul.f32 %v2663_v13, %v2661_v6 }
 0x13a   :  { %675 = vmatmul.mubr.f32.vlgmr.msra.gmra.mrb[2].mxu0 %v602_v14  ;;  %746 = vmatmul.mubr.f32.vlgmr.msra.gmra.mrb[2].mxu1 %v602_v14 }
 0x13b   :  { %2173 = vmatpush1.bf16.msra.mxu0 %v2886_v15  ;;  %2205 = vmatpush1.bf16.msra.mxu1 %v2895_v19 }
 0x13c   :  { %2175 = vmatprep.subr.bf16.mxu0 %v2898_v23  ;;  %2207 = vmatprep.subr.bf16.mxu1 %v2900_v24 }
 0x13d   :  { %851 = vmatprep.mubr.f32.mxu0 %v2803_v0  ;;  %922 = vmatprep.mubr.f32.mxu1 %v2803_v0 }
 0x13f   :  { %2177 = vmatpush1.bf16.msra.mxu0 %v2904_v28  ;;  %2209 = vmatpush1.bf16.msra.mxu1 %v2911_v32 }
 0x140   :  { %2179 = vmatprep.subr.bf16.mxu0 %v2915_v36  ;;  %2211 = vmatprep.subr.bf16.mxu1 %v2917_v37 }
 0x143   :  { %2181 = vmatpush1.bf16.msra.mxu0 %v2921_v41  ;;  %2213 = vmatpush1.bf16.msra.mxu1 %v2928_v45 }
 0x144   :  { %2183 = vmatprep.subr.bf16.mxu0 %v2932_v49  ;;  %2215 = vmatprep.subr.bf16.mxu1 %v2936_v53 }
 0x147   :  { %2185 = vmatpush1.bf16.msra.mxu0 %v2940_v56  ;;  %2217 = vmatpush1.bf16.msra.mxu1 %v2944_v60 }
 0x148   :  { %2187 = vmatprep.subr.bf16.mxu0 %v2951_v1  ;;  %2219 = vmatprep.subr.bf16.mxu1 %v2955_v4 }
 0x14b   :  { %2189 = vmatpush1.bf16.msra.mxu0 %v2959_v7  ;;  %2221 = vmatpush1.bf16.msra.mxu1 %v2963_v12 }
 0x14c   :  { %2191 = vmatprep.subr.bf16.mxu0 %v2970_v17  ;;  %2223 = vmatprep.subr.bf16.mxu1 %v2974_v21 }
 0x14f   :  { %2193 = vmatpush1.bf16.msra.mxu0 %v2978_v26  ;;  %2225 = vmatpush1.bf16.msra.mxu1 %v2982_v30 }
 0x150   :  { %2195 = vmatprep.subr.bf16.mxu0 %v2989_v35  ;;  %2227 = vmatprep.subr.bf16.mxu1 %v2993_v40 }
 0x153   :  { %2197 = vmatpush1.bf16.msra.mxu0 %v2997_v44  ;;  %2229 = vmatpush1.bf16.msra.mxu1 %v3001_v48 }
 0x154   :  { %2199 = vmatprep.subr.bf16.mxu0 %v3008_v54  ;;  %2231 = vmatprep.subr.bf16.mxu1 %v3012_v58 }
 0x157   :  { %2201 = vmatpush1.bf16.msra.mxu0 %v3016_v59  ;;  %2233 = vmatpush1.bf16.msra.mxu1 %v3020_v61 }
 0x158   :  { %2235 = vmatprep.subr.bf16.mxu0 %v2882_v10  ;;  %2267 = vmatprep.subr.bf16.mxu1 %v2884_v11 }
 0x20d   :  { %v676_v16 = vpop.f32.mrb[2].mxu0  ;;  %v747_v18 = vpop.f32.mrb[2].mxu1 }
 0x20e   :  { %v2580_v20 = vadd.f32 %v676_v16, %v3071_v8  ;;  %v678_v22 = vpop.f32.mrb[3].mxu0  ;;  %v749_v25 = vpop.f32.mrb[3].mxu1  ;;  %v2596_v42 = vadd.f32 %v747_v18, %v3080_v38 }
 0x20f   :  { %v2581_v27 = vadd.f32 %v678_v22, %v3073_v9  ;;  %v2597_v34 = vadd.f32 %v749_v25, %v3077_v31 }
 0x210   :  { %v1968_v29 = vmul.f32 -1.442695, %v2580_v20 }
 0x211   :  { %v1969_v33 = vmul.f32 -1.442695, %v2581_v27  ;;  %v1970_v39 = vmul.f32 -1.442695, %v2597_v34 }
 0x212   :  { %2664 = vpow2.f32 %v1968_v29 }
 0x213   :  { %2666 = vpow2.f32 %v1969_v33 }
 0x214   :  { %2668 = vpow2.f32 %v1970_v39 }
 0x215   :  { %2670 = vtanh.f32 %v2596_v42 }
 0x21c   :  { %v2665_v43 = vpop.eup %2664 }
 0x21d   :  { %v2667_v46 = vpop.eup %2666  ;;  %v759_v47 = vadd.f32 1.0, %v2665_v43 }
 0x21e   :  { %v765_v50 = vadd.f32 1.0, %v2667_v46  ;;  %v2669_v51 = vpop.eup %2668 }
 0x21f   :  { %2672 = vrcp.f32 %v759_v47  ;;  %v2671_v52 = vpop.eup %2670  ;;  %v772_v63 = vadd.f32 1.0, %v2669_v51 }
 0x220   :  { %2674 = vrcp.f32 %v765_v50 }
 0x221   :  { %2676 = vrcp.f32 %v772_v63 }
 0x229   :  { %v2673_v55 = vpop.eup %2672 }
 0x22a   :  { %v2675_v57 = vpop.eup %2674  ;;  %v776_v62 = vmul.f32 %v2673_v55, %v2671_v52 }
 0x22b   :  { %v775_v2 = vmul.f32 %v2675_v57, %v3086_v5  ;;  %v2677_v6 = vpop.eup %2676 }
 0x22d   :  { %v3128_v3 = vadd.f32 %v776_v62, %v775_v2 }
 0x22f   :  { %2678 = vtanh.f32 %v3128_v3 }
 0x239   :  { %v2679_v13 = vpop.eup %2678 }
 0x23a   :  { %v779_v14 = vmul.f32 %v2679_v13, %v2677_v6 }
 0x23c   :  { %852 = vmatmul.mubr.f32.vlgmr.msra.gmra.mrb[4].mxu0 %v779_v14  ;;  %923 = vmatmul.mubr.f32.vlgmr.msra.gmra.mrb[4].mxu1 %v779_v14 }
 0x23d   :  { %2237 = vmatpush1.bf16.msra.mxu0 %v2886_v15  ;;  %2269 = vmatpush1.bf16.msra.mxu1 %v2895_v19 }
 0x23e   :  { %2239 = vmatprep.subr.bf16.mxu0 %v2898_v23  ;;  %2271 = vmatprep.subr.bf16.mxu1 %v2900_v24 }
 0x23f   :  { %1028 = vmatprep.mubr.f32.mxu0 %v2803_v0  ;;  %1099 = vmatprep.mubr.f32.mxu1 %v2803_v0 }
 0x241   :  { %2241 = vmatpush1.bf16.msra.mxu0 %v2904_v28  ;;  %2273 = vmatpush1.bf16.msra.mxu1 %v2911_v32 }
 0x242   :  { %2243 = vmatprep.subr.bf16.mxu0 %v2915_v36  ;;  %2275 = vmatprep.subr.bf16.mxu1 %v2917_v37 }
 0x245   :  { %2245 = vmatpush1.bf16.msra.mxu0 %v2921_v41  ;;  %2277 = vmatpush1.bf16.msra.mxu1 %v2928_v45 }
 0x246   :  { %2247 = vmatprep.subr.bf16.mxu0 %v2932_v49  ;;  %2279 = vmatprep.subr.bf16.mxu1 %v2936_v53 }
 0x249   :  { %2249 = vmatpush1.bf16.msra.mxu0 %v2940_v56  ;;  %2281 = vmatpush1.bf16.msra.mxu1 %v2944_v60 }
 0x24a   :  { %2251 = vmatprep.subr.bf16.mxu0 %v2951_v1  ;;  %2283 = vmatprep.subr.bf16.mxu1 %v2955_v4 }
 0x24d   :  { %2253 = vmatpush1.bf16.msra.mxu0 %v2959_v7  ;;  %2285 = vmatpush1.bf16.msra.mxu1 %v2963_v12 }
 0x24e   :  { %2255 = vmatprep.subr.bf16.mxu0 %v2970_v17  ;;  %2287 = vmatprep.subr.bf16.mxu1 %v2974_v21 }
 0x251   :  { %2257 = vmatpush1.bf16.msra.mxu0 %v2978_v26  ;;  %2289 = vmatpush1.bf16.msra.mxu1 %v2982_v30 }
 0x252   :  { %2259 = vmatprep.subr.bf16.mxu0 %v2989_v35  ;;  %2291 = vmatprep.subr.bf16.mxu1 %v2993_v40 }
 0x255   :  { %2261 = vmatpush1.bf16.msra.mxu0 %v2997_v44  ;;  %2293 = vmatpush1.bf16.msra.mxu1 %v3001_v48 }
 0x256   :  { %2263 = vmatprep.subr.bf16.mxu0 %v3008_v54  ;;  %2295 = vmatprep.subr.bf16.mxu1 %v3012_v58 }
 0x259   :  { %2265 = vmatpush1.bf16.msra.mxu0 %v3016_v59  ;;  %2297 = vmatpush1.bf16.msra.mxu1 %v3020_v61 }
 0x25a   :  { %2299 = vmatprep.subr.bf16.mxu0 %v2882_v10  ;;  %2331 = vmatprep.subr.bf16.mxu1 %v2884_v11 }
 0x30f   :  { %v853_v5 = vpop.f32.mrb[4].mxu0  ;;  %v924_v16 = vpop.f32.mrb[4].mxu1 }
 0x310   :  { %v2582_v18 = vadd.f32 %v853_v5, %v3071_v8  ;;  %v855_v20 = vpop.f32.mrb[5].mxu0  ;;  %v926_v22 = vpop.f32.mrb[5].mxu1  ;;  %v2598_v39 = vadd.f32 %v924_v16, %v3080_v38 }
 0x311   :  { %v2583_v25 = vadd.f32 %v855_v20, %v3073_v9  ;;  %v2599_v33 = vadd.f32 %v926_v22, %v3077_v31 }
 0x312   :  { %v1971_v27 = vmul.f32 -1.442695, %v2582_v18 }
 0x313   :  { %v1972_v29 = vmul.f32 -1.442695, %v2583_v25  ;;  %v1973_v34 = vmul.f32 -1.442695, %v2599_v33 }
 0x314   :  { %2680 = vpow2.f32 %v1971_v27 }
 0x315   :  { %2682 = vpow2.f32 %v1972_v29 }
 0x316   :  { %2684 = vpow2.f32 %v1973_v34 }
 0x317   :  { %2686 = vtanh.f32 %v2598_v39 }
 0x31e   :  { %v2681_v42 = vpop.eup %2680 }
 0x31f   :  { %v2683_v43 = vpop.eup %2682  ;;  %v936_v46 = vadd.f32 1.0, %v2681_v42 }
 0x320   :  { %v942_v47 = vadd.f32 1.0, %v2683_v43  ;;  %v2685_v50 = vpop.eup %2684 }
 0x321   :  { %2688 = vrcp.f32 %v936_v46  ;;  %v2687_v51 = vpop.eup %2686  ;;  %v949_v62 = vadd.f32 1.0, %v2685_v50 }
 0x322   :  { %2690 = vrcp.f32 %v942_v47 }
 0x323   :  { %2692 = vrcp.f32 %v949_v62 }
 0x32b   :  { %v2689_v52 = vpop.eup %2688 }
 0x32c   :  { %v2691_v55 = vpop.eup %2690  ;;  %v953_v57 = vmul.f32 %v2689_v52, %v2687_v51 }
 0x32d   :  { %v952_v63 = vmul.f32 %v2691_v55, %v3128_v3  ;;  %v2693_v6 = vpop.eup %2692 }
 0x32f   :  { %v3170_v2 = vadd.f32 %v953_v57, %v952_v63 }
 0x331   :  { %2694 = vtanh.f32 %v3170_v2 }
 0x33b   :  { %v2695_v13 = vpop.eup %2694 }
 0x33c   :  { %v956_v14 = vmul.f32 %v2695_v13, %v2693_v6 }
 0x33e   :  { %1029 = vmatmul.mubr.f32.vlgmr.msra.gmra.mrb[6].mxu0 %v956_v14  ;;  %1100 = vmatmul.mubr.f32.vlgmr.msra.gmra.mrb[6].mxu1 %v956_v14 }
 0x33f   :  { %2301 = vmatpush1.bf16.msra.mxu0 %v2886_v15  ;;  %2333 = vmatpush1.bf16.msra.mxu1 %v2895_v19 }
 0x340   :  { %2303 = vmatprep.subr.bf16.mxu0 %v2898_v23  ;;  %2335 = vmatprep.subr.bf16.mxu1 %v2900_v24 }
 0x341   :  { %1205 = vmatprep.mubr.f32.mxu0 %v2803_v0  ;;  %1276 = vmatprep.mubr.f32.mxu1 %v2803_v0 }
 0x343   :  { %2305 = vmatpush1.bf16.msra.mxu0 %v2904_v28  ;;  %2337 = vmatpush1.bf16.msra.mxu1 %v2911_v32 }
 0x344   :  { %2307 = vmatprep.subr.bf16.mxu0 %v2915_v36  ;;  %2339 = vmatprep.subr.bf16.mxu1 %v2917_v37 }
 0x347   :  { %2309 = vmatpush1.bf16.msra.mxu0 %v2921_v41  ;;  %2341 = vmatpush1.bf16.msra.mxu1 %v2928_v45 }
 0x348   :  { %2311 = vmatprep.subr.bf16.mxu0 %v2932_v49  ;;  %2343 = vmatprep.subr.bf16.mxu1 %v2936_v53 }
 0x34b   :  { %2313 = vmatpush1.bf16.msra.mxu0 %v2940_v56  ;;  %2345 = vmatpush1.bf16.msra.mxu1 %v2944_v60 }
 0x34c   :  { %2315 = vmatprep.subr.bf16.mxu0 %v2951_v1  ;;  %2347 = vmatprep.subr.bf16.mxu1 %v2955_v4 }
 0x34f   :  { %2317 = vmatpush1.bf16.msra.mxu0 %v2959_v7  ;;  %2349 = vmatpush1.bf16.msra.mxu1 %v2963_v12 }
 0x350   :  { %2319 = vmatprep.subr.bf16.mxu0 %v2970_v17  ;;  %2351 = vmatprep.subr.bf16.mxu1 %v2974_v21 }
 0x353   :  { %2321 = vmatpush1.bf16.msra.mxu0 %v2978_v26  ;;  %2353 = vmatpush1.bf16.msra.mxu1 %v2982_v30 }
 0x354   :  { %2323 = vmatprep.subr.bf16.mxu0 %v2989_v35  ;;  %2355 = vmatprep.subr.bf16.mxu1 %v2993_v40 }
 0x357   :  { %2325 = vmatpush1.bf16.msra.mxu0 %v2997_v44  ;;  %2357 = vmatpush1.bf16.msra.mxu1 %v3001_v48 }
 0x358   :  { %2327 = vmatprep.subr.bf16.mxu0 %v3008_v54  ;;  %2359 = vmatprep.subr.bf16.mxu1 %v3012_v58 }
 0x35b   :  { %2329 = vmatpush1.bf16.msra.mxu0 %v3016_v59  ;;  %2361 = vmatpush1.bf16.msra.mxu1 %v3020_v61 }
 0x35c   :  { %2363 = vmatprep.subr.bf16.mxu0 %v2882_v10  ;;  %2395 = vmatprep.subr.bf16.mxu1 %v2884_v11 }
 0x411   :  { %v1030_v3 = vpop.f32.mrb[6].mxu0  ;;  %v1101_v5 = vpop.f32.mrb[6].mxu1 }
 0x412   :  { %v2584_v16 = vadd.f32 %v1030_v3, %v3071_v8  ;;  %v1032_v18 = vpop.f32.mrb[7].mxu0  ;;  %v1103_v20 = vpop.f32.mrb[7].mxu1  ;;  %v2600_v34 = vadd.f32 %v1101_v5, %v3080_v38 }
 0x413   :  { %v2585_v22 = vadd.f32 %v1032_v18, %v3073_v9  ;;  %v2601_v29 = vadd.f32 %v1103_v20, %v3077_v31 }
 0x414   :  { %v1974_v25 = vmul.f32 -1.442695, %v2584_v16 }
 0x415   :  { %v1975_v27 = vmul.f32 -1.442695, %v2585_v22  ;;  %v1976_v33 = vmul.f32 -1.442695, %v2601_v29 }
 0x416   :  { %2696 = vpow2.f32 %v1974_v25 }
 0x417   :  { %2698 = vpow2.f32 %v1975_v27 }
 0x418   :  { %2700 = vpow2.f32 %v1976_v33 }
 0x419   :  { %2702 = vtanh.f32 %v2600_v34 }
 0x420   :  { %v2697_v39 = vpop.eup %2696 }
 0x421   :  { %v2699_v42 = vpop.eup %2698  ;;  %v1113_v43 = vadd.f32 1.0, %v2697_v39 }
 0x422   :  { %v1119_v46 = vadd.f32 1.0, %v2699_v42  ;;  %v2701_v47 = vpop.eup %2700 }
 0x423   :  { %2704 = vrcp.f32 %v1113_v43  ;;  %v2703_v50 = vpop.eup %2702  ;;  %v1126_v57 = vadd.f32 1.0, %v2701_v47 }
 0x424   :  { %2706 = vrcp.f32 %v1119_v46 }
 0x425   :  { %2708 = vrcp.f32 %v1126_v57 }
 0x42d   :  { %v2705_v51 = vpop.eup %2704 }
 0x42e   :  { %v2707_v52 = vpop.eup %2706  ;;  %v1130_v55 = vmul.f32 %v2705_v51, %v2703_v50 }
 0x42f   :  { %v1129_v62 = vmul.f32 %v2707_v52, %v3170_v2  ;;  %v2709_v6 = vpop.eup %2708 }
 0x431   :  { %v3212_v63 = vadd.f32 %v1130_v55, %v1129_v62 }
 0x433   :  { %2710 = vtanh.f32 %v3212_v63 }
 0x43d   :  { %v2711_v13 = vpop.eup %2710 }
 0x43e   :  { %v1133_v14 = vmul.f32 %v2711_v13, %v2709_v6 }
 0x440   :  { %1206 = vmatmul.mubr.f32.vlgmr.msra.gmra.mrb[8].mxu0 %v1133_v14  ;;  %1277 = vmatmul.mubr.f32.vlgmr.msra.gmra.mrb[8].mxu1 %v1133_v14 }
 0x441   :  { %2365 = vmatpush1.bf16.msra.mxu0 %v2886_v15  ;;  %2397 = vmatpush1.bf16.msra.mxu1 %v2895_v19 }
 0x442   :  { %2367 = vmatprep.subr.bf16.mxu0 %v2898_v23  ;;  %2399 = vmatprep.subr.bf16.mxu1 %v2900_v24 }
 0x443   :  { %1382 = vmatprep.mubr.f32.mxu0 %v2803_v0  ;;  %1453 = vmatprep.mubr.f32.mxu1 %v2803_v0 }
 0x445   :  { %2369 = vmatpush1.bf16.msra.mxu0 %v2904_v28  ;;  %2401 = vmatpush1.bf16.msra.mxu1 %v2911_v32 }
 0x446   :  { %2371 = vmatprep.subr.bf16.mxu0 %v2915_v36  ;;  %2403 = vmatprep.subr.bf16.mxu1 %v2917_v37 }
 0x449   :  { %2373 = vmatpush1.bf16.msra.mxu0 %v2921_v41  ;;  %2405 = vmatpush1.bf16.msra.mxu1 %v2928_v45 }
 0x44a   :  { %2375 = vmatprep.subr.bf16.mxu0 %v2932_v49  ;;  %2407 = vmatprep.subr.bf16.mxu1 %v2936_v53 }
 0x44d   :  { %2377 = vmatpush1.bf16.msra.mxu0 %v2940_v56  ;;  %2409 = vmatpush1.bf16.msra.mxu1 %v2944_v60 }
 0x44e   :  { %2379 = vmatprep.subr.bf16.mxu0 %v2951_v1  ;;  %2411 = vmatprep.subr.bf16.mxu1 %v2955_v4 }
 0x451   :  { %2381 = vmatpush1.bf16.msra.mxu0 %v2959_v7  ;;  %2413 = vmatpush1.bf16.msra.mxu1 %v2963_v12 }
 0x452   :  { %2383 = vmatprep.subr.bf16.mxu0 %v2970_v17  ;;  %2415 = vmatprep.subr.bf16.mxu1 %v2974_v21 }
 0x455   :  { %2385 = vmatpush1.bf16.msra.mxu0 %v2978_v26  ;;  %2417 = vmatpush1.bf16.msra.mxu1 %v2982_v30 }
 0x456   :  { %2387 = vmatprep.subr.bf16.mxu0 %v2989_v35  ;;  %2419 = vmatprep.subr.bf16.mxu1 %v2993_v40 }
 0x459   :  { %2389 = vmatpush1.bf16.msra.mxu0 %v2997_v44  ;;  %2421 = vmatpush1.bf16.msra.mxu1 %v3001_v48 }
 0x45a   :  { %2391 = vmatprep.subr.bf16.mxu0 %v3008_v54  ;;  %2423 = vmatprep.subr.bf16.mxu1 %v3012_v58 }
 0x45d   :  { %2393 = vmatpush1.bf16.msra.mxu0 %v3016_v59  ;;  %2425 = vmatpush1.bf16.msra.mxu1 %v3020_v61 }
 0x45e   :  { %2427 = vmatprep.subr.bf16.mxu0 %v2882_v10  ;;  %2459 = vmatprep.subr.bf16.mxu1 %v2884_v11 }
 0x513   :  { %v1207_v2 = vpop.f32.mrb[8].mxu0  ;;  %v1278_v3 = vpop.f32.mrb[8].mxu1 }
 0x514   :  { %v2586_v5 = vadd.f32 %v1207_v2, %v3071_v8  ;;  %v1209_v16 = vpop.f32.mrb[9].mxu0  ;;  %v1280_v18 = vpop.f32.mrb[9].mxu1  ;;  %v2602_v33 = vadd.f32 %v1278_v3, %v3080_v38 }
 0x515   :  { %v2587_v20 = vadd.f32 %v1209_v16, %v3073_v9  ;;  %v2603_v27 = vadd.f32 %v1280_v18, %v3077_v31 }
 0x516   :  { %v1977_v22 = vmul.f32 -1.442695, %v2586_v5 }
 0x517   :  { %v1978_v25 = vmul.f32 -1.442695, %v2587_v20  ;;  %v1979_v29 = vmul.f32 -1.442695, %v2603_v27 }
 0x518   :  { %2712 = vpow2.f32 %v1977_v22 }
 0x519   :  { %2714 = vpow2.f32 %v1978_v25 }
 0x51a   :  { %2716 = vpow2.f32 %v1979_v29 }
 0x51b   :  { %2718 = vtanh.f32 %v2602_v33 }
 0x522   :  { %v2713_v34 = vpop.eup %2712 }
 0x523   :  { %v2715_v39 = vpop.eup %2714  ;;  %v1290_v42 = vadd.f32 1.0, %v2713_v34 }
 0x524   :  { %v1296_v43 = vadd.f32 1.0, %v2715_v39  ;;  %v2717_v46 = vpop.eup %2716 }
 0x525   :  { %2720 = vrcp.f32 %v1290_v42  ;;  %v2719_v47 = vpop.eup %2718  ;;  %v1303_v55 = vadd.f32 1.0, %v2717_v46 }
 0x526   :  { %2722 = vrcp.f32 %v1296_v43 }
 0x527   :  { %2724 = vrcp.f32 %v1303_v55 }
 0x52f   :  { %v2721_v50 = vpop.eup %2720 }
 0x530   :  { %v2723_v51 = vpop.eup %2722  ;;  %v1307_v52 = vmul.f32 %v2721_v50, %v2719_v47 }
 0x531   :  { %v1306_v57 = vmul.f32 %v2723_v51, %v3212_v63  ;;  %v2725_v6 = vpop.eup %2724 }
 0x533   :  { %v3254_v62 = vadd.f32 %v1307_v52, %v1306_v57 }
 0x535   :  { %2726 = vtanh.f32 %v3254_v62 }
 0x53f   :  { %v2727_v13 = vpop.eup %2726 }
 0x540   :  { %v1310_v14 = vmul.f32 %v2727_v13, %v2725_v6  ;;  %v1845_v13 = vld [vmem:[%s3403_s4 + $0x18] sm:$0xff] }
 0x542   :  { %1383 = vmatmul.mubr.f32.vlgmr.msra.gmra.mrb[10].mxu0 %v1310_v14  ;;  %1454 = vmatmul.mubr.f32.vlgmr.msra.gmra.mrb[10].mxu1 %v1310_v14 }
 0x543   :  { %2429 = vmatpush1.bf16.msra.mxu0 %v2886_v15  ;;  %2461 = vmatpush1.bf16.msra.mxu1 %v2895_v19 }
 0x544   :  { %2431 = vmatprep.subr.bf16.mxu0 %v2898_v23  ;;  %2463 = vmatprep.subr.bf16.mxu1 %v2900_v24 }
 0x545   :  { %1559 = vmatprep.mubr.f32.mxu0 %v2803_v0  ;;  %1630 = vmatprep.mubr.f32.mxu1 %v2803_v0 }
 0x547   :  { %2433 = vmatpush1.bf16.msra.mxu0 %v2904_v28  ;;  %2465 = vmatpush1.bf16.msra.mxu1 %v2911_v32 }
 0x548   :  { %2435 = vmatprep.subr.bf16.mxu0 %v2915_v36  ;;  %2467 = vmatprep.subr.bf16.mxu1 %v2917_v37 }
 0x54b   :  { %2437 = vmatpush1.bf16.msra.mxu0 %v2921_v41  ;;  %2469 = vmatpush1.bf16.msra.mxu1 %v2928_v45 }
 0x54c   :  { %2439 = vmatprep.subr.bf16.mxu0 %v2932_v49  ;;  %2471 = vmatprep.subr.bf16.mxu1 %v2936_v53 }
 0x54f   :  { %2441 = vmatpush1.bf16.msra.mxu0 %v2940_v56  ;;  %2473 = vmatpush1.bf16.msra.mxu1 %v2944_v60 }
 0x550   :  { %2443 = vmatprep.subr.bf16.mxu0 %v2951_v1  ;;  %2475 = vmatprep.subr.bf16.mxu1 %v2955_v4 }
 0x553   :  { %2445 = vmatpush1.bf16.msra.mxu0 %v2959_v7  ;;  %2477 = vmatpush1.bf16.msra.mxu1 %v2963_v12 }
 0x554   :  { %2447 = vmatprep.subr.bf16.mxu0 %v2970_v17  ;;  %2479 = vmatprep.subr.bf16.mxu1 %v2974_v21 }
 0x557   :  { %2449 = vmatpush1.bf16.msra.mxu0 %v2978_v26  ;;  %2481 = vmatpush1.bf16.msra.mxu1 %v2982_v30 }
 0x558   :  { %2451 = vmatprep.subr.bf16.mxu0 %v2989_v35  ;;  %2483 = vmatprep.subr.bf16.mxu1 %v2993_v40 }
 0x55b   :  { %2453 = vmatpush1.bf16.msra.mxu0 %v2997_v44  ;;  %2485 = vmatpush1.bf16.msra.mxu1 %v3001_v48 }
 0x55c   :  { %2455 = vmatprep.subr.bf16.mxu0 %v3008_v54  ;;  %2487 = vmatprep.subr.bf16.mxu1 %v3012_v58 }
 0x55f   :  { %2457 = vmatpush1.bf16.msra.mxu0 %v3016_v59  ;;  %2489 = vmatpush1.bf16.msra.mxu1 %v3020_v61 }
 0x560   :  { %2491 = vmatprep.subr.bf16.mxu0 %v2882_v10  ;;  %2523 = vmatprep.subr.bf16.mxu1 %v2884_v11 }
 0x615   :  { %v1384_v63 = vpop.f32.mrb[10].mxu0  ;;  %v1455_v2 = vpop.f32.mrb[10].mxu1 }
 0x616   :  { %v2588_v3 = vadd.f32 %v1384_v63, %v3071_v8  ;;  %v1386_v5 = vpop.f32.mrb[11].mxu0  ;;  %v1457_v16 = vpop.f32.mrb[11].mxu1  ;;  %v2604_v29 = vadd.f32 %v1455_v2, %v3080_v38  ;;  %v1846_v63 = vld [vmem:[%s3403_s4 + $0x20] sm:$0xff]  ;;  %v1847_v2 = vld [vmem:[%s3403_s4 + $0x28] sm:$0xff] }
 0x617   :  { %v2589_v18 = vadd.f32 %v1386_v5, %v3073_v9  ;;  %v2605_v25 = vadd.f32 %v1457_v16, %v3077_v31  ;;  %v1848_v5 = vld [vmem:[%s3403_s4 + $0x30] sm:$0xff]  ;;  %v1849_v16 = vld [vmem:[%s3403_s4 + $0x38] sm:$0xff] }
 0x618   :  { %v1980_v20 = vmul.f32 -1.442695, %v2588_v3  ;;  %v2561_v3 = vpack.c.bf16 %v1847_v2, %v1846_v63 }
 0x619   :  { %v1981_v22 = vmul.f32 -1.442695, %v2589_v18  ;;  %v1982_v27 = vmul.f32 -1.442695, %v2605_v25  ;;  %v2564_v18 = vpack.c.bf16 %v1849_v16, %v1848_v5 }
 0x61a   :  { %2728 = vpow2.f32 %v1980_v20  ;;  %v1850_v20 = vld [vmem:[%s3403_s4 + $0x40] sm:$0xff] }
 0x61b   :  { %2730 = vpow2.f32 %v1981_v22  ;;  %v1851_v22 = vld [vmem:[%s3403_s4 + $0x48] sm:$0xff] }
 0x61c   :  { %2732 = vpow2.f32 %v1982_v27  ;;  %v2567_v25 = vpack.c.bf16 %v1851_v22, %v1850_v20  ;;  %v1852_v27 = vld [vmem:[%s3403_s4 + $0x50] sm:$0xff] }
 0x61d   :  { %2734 = vtanh.f32 %v2604_v29  ;;  %v1853_v29 = vld [vmem:[%s3403_s4 + $0x58] sm:$0xff] }
 0x624   :  { %v2729_v10 = vpop.eup %2728 }
 0x625   :  { %v2731_v33 = vpop.eup %2730  ;;  %v1467_v11 = vadd.f32 1.0, %v2729_v10  ;;  %v1854_v10 = vld [vmem:[%s3403_s4 + $0x60] sm:$0xff] }
 0x626   :  { %v1473_v34 = vadd.f32 1.0, %v2731_v33  ;;  %v2733_v39 = vpop.eup %2732  ;;  %v2570_v33 = vpack.c.bf16 %v1853_v29, %v1852_v27 }
 0x627   :  { %2736 = vrcp.f32 %v1467_v11  ;;  %v2735_v42 = vpop.eup %2734  ;;  %v1480_v50 = vadd.f32 1.0, %v2733_v39  ;;  %v1855_v11 = vld [vmem:[%s3403_s4 + $0x68] sm:$0xff]  ;;  %v1856_v39 = vld [vmem:[%s3403_s4 + $0x70] sm:$0xff] }
 0x628   :  { %2738 = vrcp.f32 %v1473_v34  ;;  %v2573_v34 = vpack.c.bf16 %v1855_v11, %v1854_v10 }
 0x629   :  { %2740 = vrcp.f32 %v1480_v50 }
 0x631   :  { %v2737_v43 = vpop.eup %2736 }
 0x632   :  { %v2739_v46 = vpop.eup %2738  ;;  %v1484_v47 = vmul.f32 %v2737_v43, %v2735_v42  ;;  %v1857_v42 = vld [vmem:[%s3403_s4 + $0x78] sm:$0xff] }
 0x633   :  { %v1483_v51 = vmul.f32 %v2739_v46, %v3254_v62  ;;  %v2741_v55 = vpop.eup %2740  ;;  %v1844_v62 = vld [vmem:[%s3403_s4 + $0x10] sm:$0xff]  ;;  %v2576_v43 = vpack.c.bf16 %v1857_v42, %v1856_v39 }
 0x634   :  { %v2558_v14 = vpack.c.bf16 %v1845_v13, %v1844_v62 }
 0x635   :  { %v3296_v52 = vadd.f32 %v1484_v47, %v1483_v51 }
 0x637   :  { %2742 = vtanh.f32 %v3296_v52 }
 0x641   :  { %v2743_v57 = vpop.eup %2742 }
 0x642   :  { %v1487_v6 = vmul.f32 %v2743_v57, %v2741_v55 }
 0x644   :  { %1560 = vmatmul.mubr.f32.vlgmr.msra.gmra.mrb[12].mxu0 %v1487_v6  ;;  %1631 = vmatmul.mubr.f32.vlgmr.msra.gmra.mrb[12].mxu1 %v1487_v6 }
 0x645   :  { %2493 = vmatpush1.bf16.msra.mxu0 %v2886_v15  ;;  %2525 = vmatpush1.bf16.msra.mxu1 %v2895_v19 }
 0x646   :  { %2495 = vmatprep.subr.bf16.mxu0 %v2898_v23  ;;  %2527 = vmatprep.subr.bf16.mxu1 %v2900_v24 }
 0x647   :  { %1736 = vmatprep.mubr.f32.mxu0 %v2803_v0  ;;  %1807 = vmatprep.mubr.f32.mxu1 %v2803_v0 }
 0x649   :  { %2497 = vmatpush1.bf16.msra.mxu0 %v2904_v28  ;;  %2529 = vmatpush1.bf16.msra.mxu1 %v2911_v32 }
 0x64a   :  { %2499 = vmatprep.subr.bf16.mxu0 %v2915_v36  ;;  %2531 = vmatprep.subr.bf16.mxu1 %v2917_v37 }
 0x64d   :  { %2501 = vmatpush1.bf16.msra.mxu0 %v2921_v41  ;;  %2533 = vmatpush1.bf16.msra.mxu1 %v2928_v45 }
 0x64e   :  { %2503 = vmatprep.subr.bf16.mxu0 %v2932_v49  ;;  %2535 = vmatprep.subr.bf16.mxu1 %v2936_v53 }
 0x651   :  { %2505 = vmatpush1.bf16.msra.mxu0 %v2940_v56  ;;  %2537 = vmatpush1.bf16.msra.mxu1 %v2944_v60 }
 0x652   :  { %2507 = vmatprep.subr.bf16.mxu0 %v2951_v1  ;;  %2539 = vmatprep.subr.bf16.mxu1 %v2955_v4 }
 0x655   :  { %2509 = vmatpush1.bf16.msra.mxu0 %v2959_v7  ;;  %2541 = vmatpush1.bf16.msra.mxu1 %v2963_v12 }
 0x656   :  { %2511 = vmatprep.subr.bf16.mxu0 %v2970_v17  ;;  %2543 = vmatprep.subr.bf16.mxu1 %v2974_v21 }
 0x659   :  { %2513 = vmatpush1.bf16.msra.mxu0 %v2978_v26  ;;  %2545 = vmatpush1.bf16.msra.mxu1 %v2982_v30 }
 0x65a   :  { %2515 = vmatprep.subr.bf16.mxu0 %v2989_v35  ;;  %2547 = vmatprep.subr.bf16.mxu1 %v2993_v40 }
 0x65d   :  { %2517 = vmatpush1.bf16.msra.mxu0 %v2997_v44  ;;  %2549 = vmatpush1.bf16.msra.mxu1 %v3001_v48 }
 0x65e   :  { %2519 = vmatprep.subr.bf16.mxu0 %v3008_v54  ;;  %2551 = vmatprep.subr.bf16.mxu1 %v3012_v58  ;;  %v1842_v54 = vld [vmem:[%s3403_s4] sm:$0xff]  ;;  %v1843_v58 = vld [vmem:[%s3403_s4 + $0x8] sm:$0xff] }
 0x661   :  { %2521 = vmatpush1.bf16.msra.mxu0 %v3016_v59  ;;  %2553 = vmatpush1.bf16.msra.mxu1 %v3020_v61  ;;  %v2555_v59 = vpack.c.bf16 %v1843_v58, %v1842_v54  ;;  %v2804_v61 = vmov 0.0|0.0  }
 0x662   :  { %2554 = vmatprep.subr.bf16.mxu0 %v2804_v61 }
 0x717   :  { %v1561_v15 = vpop.f32.mrb[12].mxu0  ;;  %v1632_v19 = vpop.f32.mrb[12].mxu1 }
 0x718   :  { %v2590_v23 = vadd.f32 %v1561_v15, %v3071_v8  ;;  %v1563_v24 = vpop.f32.mrb[13].mxu0  ;;  %v1634_v28 = vpop.f32.mrb[13].mxu1  ;;  %v2606_v49 = vadd.f32 %v1632_v19, %v3080_v38 }
 0x719   :  { %v2591_v32 = vadd.f32 %v1563_v24, %v3073_v9  ;;  %v2607_v41 = vadd.f32 %v1634_v28, %v3077_v31 }
 0x71a   :  { %v1983_v36 = vmul.f32 -1.442695, %v2590_v23 }
 0x71b   :  { %v1984_v37 = vmul.f32 -1.442695, %v2591_v32  ;;  %v1985_v45 = vmul.f32 -1.442695, %v2607_v41 }
 0x71c   :  { %2744 = vpow2.f32 %v1983_v36 }
 0x71d   :  { %2746 = vpow2.f32 %v1984_v37 }
 0x71e   :  { %2748 = vpow2.f32 %v1985_v45 }
 0x71f   :  { %2750 = vtanh.f32 %v2606_v49 }
 0x726   :  { %v2745_v53 = vpop.eup %2744 }
 0x727   :  { %v2747_v56 = vpop.eup %2746  ;;  %v1644_v60 = vadd.f32 1.0, %v2745_v53 }
 0x728   :  { %v1650_v1 = vadd.f32 1.0, %v2747_v56  ;;  %v2749_v4 = vpop.eup %2748 }
 0x729   :  { %2752 = vrcp.f32 %v1644_v60  ;;  %v2751_v7 = vpop.eup %2750  ;;  %v1657_v26 = vadd.f32 1.0, %v2749_v4  ;;  %v1989_v60 = vld [vmem:[%s3404_s5] ss:$0 sm:$0xff] }
 0x72a   :  { %2754 = vrcp.f32 %v1650_v1 }
 0x72b   :  { %2756 = vrcp.f32 %v1657_v26 }
 0x733   :  { %v2753_v12 = vpop.eup %2752 }
 0x734   :  { %v2755_v17 = vpop.eup %2754  ;;  %v1661_v21 = vmul.f32 %v2753_v12, %v2751_v7 }
 0x735   :  { %v1660_v30 = vmul.f32 %v2755_v17, %v3296_v52  ;;  %v2757_v40 = vpop.eup %2756 }
 0x737   :  { %v3336_v35 = vadd.f32 %v1661_v21, %v1660_v30 }
 0x739   :  { %2758 = vtanh.f32 %v3336_v35 }
 0x743   :  { %v2759_v44 = vpop.eup %2758 }
 0x744   :  { %v1664_v48 = vmul.f32 %v2759_v44, %v2757_v40 }
 0x746   :  { %1737 = vmatmul.mubr.f32.vlgmr.msra.gmra.mrb[14].mxu0 %v1664_v48  ;;  %1808 = vmatmul.mubr.f32.vlgmr.msra.gmra.mrb[14].mxu1 %v1664_v48 }
 0x747   :  { %2556 = vmatpush3.bf16.msra.mxu0 %v2555_v59  ;;  %2039 = vmatprep.mubr.msk.f32.mxu0 %vm2805_vm1, %v2803_v0 }
 0x748   :  { %2557 = vmatprep.subr.bf16.mxu0 %v2804_v61 }
 0x74b   :  { %2559 = vmatpush3.bf16.msra.mxu0 %v2558_v14 }
 0x74c   :  { %2560 = vmatprep.subr.bf16.mxu0 %v2804_v61 }
 0x74f   :  { %2562 = vmatpush3.bf16.msra.mxu0 %v2561_v3 }
 0x750   :  { %2563 = vmatprep.subr.bf16.mxu0 %v2804_v61 }
 0x753   :  { %2565 = vmatpush3.bf16.msra.mxu0 %v2564_v18 }
 0x754   :  { %2566 = vmatprep.subr.bf16.mxu0 %v2804_v61 }
 0x757   :  { %2568 = vmatpush3.bf16.msra.mxu0 %v2567_v25 }
 0x758   :  { %2569 = vmatprep.subr.bf16.mxu0 %v2804_v61 }
 0x75b   :  { %2571 = vmatpush3.bf16.msra.mxu0 %v2570_v33 }
 0x75c   :  { %2572 = vmatprep.subr.bf16.mxu0 %v2804_v61 }
 0x75f   :  { %2574 = vmatpush3.bf16.msra.mxu0 %v2573_v34 }
 0x760   :  { %2575 = vmatprep.subr.bf16.mxu0 %v2804_v61 }
 0x763   :  { %2577 = vmatpush3.bf16.msra.mxu0 %v2576_v43 }
 0x819   :  { %v1738_v46 = vpop.f32.mrb[14].mxu0  ;;  %v1809_v47 = vpop.f32.mrb[14].mxu1 }
 0x81a   :  { %v2592_v50 = vadd.f32 %v1738_v46, %v3071_v8  ;;  %v1740_v0 = vpop.f32.mrb[15].mxu0  ;;  %v1811_v51 = vpop.f32.mrb[15].mxu1  ;;  %v2608_v19 = vadd.f32 %v1809_v47, %v3080_v38 }
 0x81b   :  { %v2593_v52 = vadd.f32 %v1740_v0, %v3073_v9  ;;  %v2609_v6 = vadd.f32 %v1811_v51, %v3077_v31 }
 0x81c   :  { %v1986_v55 = vmul.f32 -1.442695, %v2592_v50 }
 0x81d   :  { %v1987_v57 = vmul.f32 -1.442695, %v2593_v52  ;;  %v1988_v15 = vmul.f32 -1.442695, %v2609_v6 }
 0x81e   :  { %2760 = vpow2.f32 %v1986_v55 }
 0x81f   :  { %2762 = vpow2.f32 %v1987_v57 }
 0x820   :  { %2764 = vpow2.f32 %v1988_v15 }
 0x821   :  { %2766 = vtanh.f32 %v2608_v19 }
 0x828   :  { %v2761_v23 = vpop.eup %2760 }
 0x829   :  { %v2763_v24 = vpop.eup %2762  ;;  %v1821_v28 = vadd.f32 1.0, %v2761_v23 }
 0x82a   :  { %v1827_v32 = vadd.f32 1.0, %v2763_v24  ;;  %v2765_v8 = vpop.eup %2764 }
 0x82b   :  { %2768 = vrcp.f32 %v1821_v28  ;;  %v2767_v36 = vpop.eup %2766  ;;  %v1834_v45 = vadd.f32 1.0, %v2765_v8 }
 0x82c   :  { %2770 = vrcp.f32 %v1827_v32 }
 0x82d   :  { %2772 = vrcp.f32 %v1834_v45 }
 0x835   :  { %v2769_v9 = vpop.eup %2768 }
 0x836   :  { %v2771_v37 = vpop.eup %2770  ;;  %v1838_v41 = vmul.f32 %v2769_v9, %v2767_v36 }
 0x837   :  { %v1837_v49 = vmul.f32 %v2771_v37, %v3336_v35  ;;  %v2773_v38 = vpop.eup %2772 }
 0x839   :  { %v1839_v31 = vadd.f32 %v1838_v41, %v1837_v49 }
 0x83b   :  { %2774 = vtanh.f32 %v1839_v31 }
 0x845   :  { %v2775_v53 = vpop.eup %2774 }
 0x846   :  { %v1841_v56 = vmul.f32 %v2775_v53, %v2773_v38 }
 0x848   :  { %2040 = vmatmul.mubr.f32.vlgmr.msra.gmra.mrb[16].mxu0 %v1841_v56 }
 0x91b   :  { %v1931_v1 = vpop.f32.mrb[16].mxu0 }
 0x91c   :  { %v1932_v4 = vadd.f32 %v1989_v60, %v1931_v1  ;;  %v2041_v7 = vpop.f32.mrb[17].mxu0 }
 0x91e   :  { %1936 = vst.msk [vmem:[%s3407_s8] sm:$0xff] %vm1935_vm2, %v1932_v4 }
 0x91f   :  { %1941 = vsyncpa [#allocation4], 1 }

</bundles_post_ra>
